<compile_context>
chip_gen: v7x
topology: tpu7x:2x2x1
jax: 0.10.0
libtpu: 0.0.40
codegen_flags: <defaults>
</compile_context>

<pallas_src>
import functools

import jax
import jax.numpy as jnp
from jax.experimental import pallas as pl
from jax.experimental.pallas import tpu as pltpu


def _round_up(x, m):
    return ((x + m - 1) // m) * m


# ----------------------------------------------------------------------------
# Fused GEMM:  out = act( A @ B + bias [+ residual] )
#   A: (M, K) bf16 im2col activations, B: (K, N) bf16 folded conv weights,
#   bias: (1, N) f32 folded BN bias, residual: optional (M, N) bf16.
# Grid (M//tm, N//tn, K//tk) with a persistent f32 accumulator scratch.
# ----------------------------------------------------------------------------

def _gemm_epilogue_kernel(*refs, relu, add_res):
    if add_res:
        a_ref, b_ref, bias_ref, res_ref, o_ref, acc_ref = refs
    else:
        a_ref, b_ref, bias_ref, o_ref, acc_ref = refs
        res_ref = None
    k = pl.program_id(2)

    @pl.when(k == 0)
    def _():
        acc_ref[...] = jnp.zeros_like(acc_ref)

    acc_ref[...] += jnp.dot(a_ref[...], b_ref[...],
                            preferred_element_type=jnp.float32)

    @pl.when(k == pl.num_programs(2) - 1)
    def _():
        y = acc_ref[...] + bias_ref[...]              # f32 epilogue
        if add_res:
            y = y + res_ref[...].astype(jnp.float32)
        if relu:
            y = jnp.maximum(y, 0.0)
        o_ref[...] = y.astype(o_ref.dtype)


def fused_gemm(a, b, bias, residual=None, relu=True, out_dtype=jnp.bfloat16):
    """(M, K) @ (K, N) + bias (+ residual) (+ ReLU); bf16 MXU, f32 accumulate."""
    M, K = a.shape
    Kb, N = b.shape
    assert K == Kb

    # --- tile selection ------------------------------------------------------
    # K tile: whole K if small, else 512-wide reduction chunks.
    if K <= 512:
        tk, Kp = K, K
    else:
        tk = 512
        Kp = _round_up(K, tk)
    # N tile: keep the output lane-dense (tn == full N when small, else a
    # multiple of 128 so stores are unmasked).
    if N <= 256:
        tn, Np = N, N
    else:
        tn = 256
        Np = _round_up(N, tn)
    # M tile: wider when the N tile is narrow -> fewer grid steps, better
    # B-tile reuse; working set stays ~2 MiB with double-buffering.
    tm_target = 512 if tn <= 128 else 256
    Mp = _round_up(M, 8)
    if Mp <= tm_target:
        tm = Mp
    else:
        tm = tm_target
        Mp = _round_up(M, tm)

    a = a.astype(jnp.bfloat16)
    b = b.astype(jnp.bfloat16)
    bias = bias.reshape(1, N).astype(jnp.float32)
    if Mp != M or Kp != K:
        a = jnp.pad(a, ((0, Mp - M), (0, Kp - K)))
    if Kp != K or Np != N:
        b = jnp.pad(b, ((0, Kp - K), (0, Np - N)))
    if Np != N:
        bias = jnp.pad(bias, ((0, 0), (0, Np - N)))

    in_specs = [
        pl.BlockSpec((tm, tk), lambda i, j, k: (i, k)),
        pl.BlockSpec((tk, tn), lambda i, j, k: (k, j)),
        pl.BlockSpec((1, tn), lambda i, j, k: (0, j)),
    ]
    operands = [a, b, bias]
    bytes_accessed = (Mp * Kp + Kp * Np) * 2 + Mp * Np * 2 + 4 * Np
    if residual is not None:
        r = residual.astype(jnp.bfloat16)
        if Mp != M or Np != N:
            r = jnp.pad(r, ((0, Mp - M), (0, Np - N)))
        in_specs.append(pl.BlockSpec((tm, tn), lambda i, j, k: (i, j)))
        operands.append(r)
        bytes_accessed += Mp * Np * 2

    out = pl.pallas_call(
        functools.partial(_gemm_epilogue_kernel, relu=relu,
                          add_res=residual is not None),
        out_shape=jax.ShapeDtypeStruct((Mp, Np), out_dtype),
        grid=(Mp // tm, Np // tn, Kp // tk),
        in_specs=in_specs,
        out_specs=pl.BlockSpec((tm, tn), lambda i, j, k: (i, j)),
        scratch_shapes=[pltpu.VMEM((tm, tn), jnp.float32)],
        compiler_params=pltpu.CompilerParams(
            dimension_semantics=("parallel", "parallel", "arbitrary")),
        cost_estimate=pl.CostEstimate(
            flops=2 * Mp * Np * Kp,
            transcendentals=0,
            bytes_accessed=int(bytes_accessed)),
    )(*operands)
    if Mp != M or Np != N:
        out = out[:M, :N]
    return out


# ----------------------------------------------------------------------------
# Conv (+ folded BN) (+ optional fused residual/ReLU): im2col glue + fused GEMM.
# ----------------------------------------------------------------------------

def conv_bn(x, w, bias, *, stride=1, padding=0, relu=True, residual=None):
    """Bias-free conv with BatchNorm folded into (w, bias); the bias-add,
    optional residual add and ReLU are fused into the GEMM epilogue.
    NHWC in / NHWC out, bf16 activations."""
    n, h, ww_, cin = x.shape
    kh, kw, _, cout = w.shape
    if padding:
        x = jnp.pad(x, ((0, 0), (padding, padding), (padding, padding), (0, 0)))
    hp, wp = h + 2 * padding, ww_ + 2 * padding
    ho = (hp - kh) // stride + 1
    wo = (wp - kw) // stride + 1
    if kh == 1 and kw == 1 and stride == 1:
        a = x.reshape(n * ho * wo, cin)
    else:
        # TODO(synk): eliminate the materialized im2col (accumulate kh*kw taps
        # inside the GEMM) -- overlapping strided windows are not expressible
        # with rectangular BlockSpecs; gather is kept at JAX level but in bf16
        # to halve its HBM cost.
        cols = []
        for i in range(kh):
            for j in range(kw):
                cols.append(x[:, i:i + stride * ho:stride,
                              j:j + stride * wo:stride, :])
        a = jnp.concatenate(cols, axis=-1).reshape(n * ho * wo, kh * kw * cin)
    b = w.reshape(kh * kw * cin, cout)
    res2d = None
    if residual is not None:
        res2d = residual.reshape(n * ho * wo, cout)
    out = fused_gemm(a, b, bias, residual=res2d, relu=relu)
    return out.reshape(n, ho, wo, cout)


# ----------------------------------------------------------------------------
# MaxPool2d(kernel_size=3, stride=2, padding=1): 9 shifted slabs combined by
# chained VPU maximum in one row-tiled kernel (runs once, negligible cost).
# ----------------------------------------------------------------------------

def _max9_kernel(*refs):
    o_ref = refs[-1]
    m = refs[0][...]
    for r in refs[1:-1]:
        m = jnp.maximum(m, r[...])
    o_ref[...] = m


def maxpool_3x3_s2(x):
    n, h, w, c = x.shape
    k, stride, pad = 3, 2, 1
    ho = (h + 2 * pad - k) // stride + 1
    wo = (w + 2 * pad - k) // stride + 1
    neg = jnp.finfo(x.dtype).min
    xp = jnp.pad(x, ((0, 0), (pad, pad), (pad, pad), (0, 0)),
                 constant_values=neg)
    M = n * ho * wo
    Mp = _round_up(M, 8)
    slabs = []
    for i in range(k):
        for j in range(k):
            s = xp[:, i:i + stride * ho:stride,
                   j:j + stride * wo:stride, :].reshape(M, c)
            if Mp != M:
                s = jnp.pad(s, ((0, Mp - M), (0, 0)))
            slabs.append(s)
    tm = next(t for t in (512, 256, 128, 64, 32, 16, 8) if Mp % t == 0)
    y = pl.pallas_call(
        _max9_kernel,
        out_shape=jax.ShapeDtypeStruct((Mp, c), x.dtype),
        grid=(Mp // tm,),
        in_specs=[pl.BlockSpec((tm, c), lambda i: (i, 0))] * 9,
        out_specs=pl.BlockSpec((tm, c), lambda i: (i, 0)),
        compiler_params=pltpu.CompilerParams(
            dimension_semantics=("parallel",)),
    )(*slabs)
    return y[:M].reshape(n, ho, wo, c)


# ----------------------------------------------------------------------------
# AdaptiveAvgPool2d((1, 1)) -- per-batch spatial mean, f32 output.
# ----------------------------------------------------------------------------

def _gap_kernel(x_ref, o_ref):
    o_ref[...] = jnp.mean(x_ref[...].astype(jnp.float32), axis=1,
                          keepdims=True)


def global_avg_pool(x):
    n, h, w, c = x.shape
    y = pl.pallas_call(
        _gap_kernel,
        out_shape=jax.ShapeDtypeStruct((n, 1, c), jnp.float32),
        grid=(n,),
        in_specs=[pl.BlockSpec((1, h * w, c), lambda i: (i, 0, 0))],
        out_specs=pl.BlockSpec((1, 1, c), lambda i: (i, 0, 0)),
        compiler_params=pltpu.CompilerParams(
            dimension_semantics=("parallel",)),
    )(x.reshape(n, h * w, c))
    return y.reshape(n, c)


# ----------------------------------------------------------------------------
# Deterministic synthetic parameters with BatchNorm folded in at init
# (inference mode: scale = gamma/sqrt(var+eps) multiplies the conv weight,
# bias = beta - mean*scale rides in the GEMM epilogue).
# ----------------------------------------------------------------------------

class _KeyGen:
    def __init__(self, key):
        self._key = key
        self._i = 0

    def __call__(self):
        self._i += 1
        return jax.random.fold_in(self._key, self._i)


def _init_conv(key, kh, kw, cin, cout):
    fan_in = kh * kw * cin
    return (jax.random.normal(key, (kh, kw, cin, cout), dtype=jnp.float32)
            * (2.0 / fan_in) ** 0.5)


def _init_bn(key, c):
    k1, k2, k3, k4 = jax.random.split(key, 4)
    return dict(
        gamma=1.0 + 0.1 * jax.random.normal(k1, (c,), dtype=jnp.float32),
        beta=0.1 * jax.random.normal(k2, (c,), dtype=jnp.float32),
        mean=0.1 * jax.random.normal(k3, (c,), dtype=jnp.float32),
        var=jnp.abs(jax.random.normal(k4, (c,), dtype=jnp.float32)) + 0.5,
    )


def _fold_conv_bn(conv_key, bn_key, kh, kw, cin, cout):
    w = _init_conv(conv_key, kh, kw, cin, cout)
    bn = _init_bn(bn_key, cout)
    scale = bn["gamma"] / jnp.sqrt(bn["var"] + 1e-5)
    bias = bn["beta"] - bn["mean"] * scale
    return dict(w=(w * scale[None, None, None, :]).astype(jnp.bfloat16),
                b=bias.astype(jnp.float32))


def init_resnet(key, base_width=16, blocks=(1, 1, 1, 1)):
    """resnet152 structure: the real model is base_width=64, blocks=(3,8,36,3)."""
    kg = _KeyGen(key)
    expansion = 4
    params = {"stem": _fold_conv_bn(kg(), kg(), 7, 7, 3, base_width),
              "layers": []}
    cin = base_width
    for n_blk, mult, stage_stride in zip(blocks, (1, 2, 4, 8), (1, 2, 2, 2)):
        width = base_width * mult
        stage = []
        for bi in range(n_blk):
            s = stage_stride if bi == 0 else 1
            p = {
                "cb1": _fold_conv_bn(kg(), kg(), 1, 1, cin, width),
                "cb2": _fold_conv_bn(kg(), kg(), 3, 3, width, width),
                "cb3": _fold_conv_bn(kg(), kg(), 1, 1, width,
                                     width * expansion),
            }
            if s != 1 or cin != width * expansion:
                p["down"] = _fold_conv_bn(kg(), kg(), 1, 1, cin,
                                          width * expansion)
            stage.append(dict(params=p, stride=s))
            cin = width * expansion
        params["layers"].append(stage)
    return params


# ----------------------------------------------------------------------------
# Forward pass (ResnetModule.forward with delete_starting='fc')
# ----------------------------------------------------------------------------

def _bottleneck(x, p, stride):
    out = conv_bn(x, p["cb1"]["w"], p["cb1"]["b"], stride=1, padding=0,
                  relu=True)
    out = conv_bn(out, p["cb2"]["w"], p["cb2"]["b"], stride=stride, padding=1,
                  relu=True)
    if "down" in p:
        identity = conv_bn(x, p["down"]["w"], p["down"]["b"], stride=stride,
                           padding=0, relu=False)
    else:
        identity = x
    # conv3 + bn3 + residual-add + ReLU all fused into one GEMM epilogue.
    return conv_bn(out, p["cb3"]["w"], p["cb3"]["b"], stride=1, padding=0,
                   relu=True, residual=identity)


def resnet_forward(x_nchw, params):
    x = jnp.transpose(x_nchw, (0, 2, 3, 1)).astype(jnp.bfloat16)   # NCHW->NHWC
    x = conv_bn(x, params["stem"]["w"], params["stem"]["b"],
                stride=2, padding=3, relu=True)
    x = maxpool_3x3_s2(x)
    for stage in params["layers"]:
        for blk in stage:
            x = _bottleneck(x, blk["params"], blk["stride"])
    feats = global_avg_pool(x)                  # (N, C_out) f32
    return feats[:, :, None, None]              # NCHW (N, C_out, 1, 1)


# ----------------------------------------------------------------------------
# Demo
# ----------------------------------------------------------------------------

if __name__ == "__main__":
    key = jax.random.PRNGKey(0)

    # Sanity check of the fused GEMM (exercises M/N/K tiling + padding +
    # residual/ReLU epilogue) against a jnp reference with the same bf16
    # operand rounding.
    ka, kb, kc, kd = jax.random.split(jax.random.fold_in(key, 7), 4)
    am = jax.random.normal(ka, (300, 700), jnp.float32)
    bm = jax.random.normal(kb, (700, 384), jnp.float32)
    bv = jax.random.normal(kc, (384,), jnp.float32)
    rm = jax.random.normal(kd, (300, 384), jnp.float32)
    got = fused_gemm(am, bm, bv, residual=rm, relu=True).astype(jnp.float32)
    ref = jnp.maximum(
        jnp.dot(am.astype(jnp.bfloat16).astype(jnp.float32),
                bm.astype(jnp.bfloat16).astype(jnp.float32))
        + bv[None, :] + rm.astype(jnp.bfloat16).astype(jnp.float32), 0.0)
    assert bool(jnp.allclose(got, ref, rtol=2e-2, atol=0.5)), "fused_gemm mismatch"

    # Also exercise the wide-M / narrow-N tile path (tm=512 branch).
    ke, kf = jax.random.split(jax.random.fold_in(key, 9), 2)
    am2 = jax.random.normal(ke, (1024, 96), jnp.float32)
    bm2 = jax.random.normal(kf, (96, 64), jnp.float32)
    got2 = fused_gemm(am2, bm2, jnp.zeros((64,), jnp.float32),
                      relu=False).astype(jnp.float32)
    ref2 = jnp.dot(am2.astype(jnp.bfloat16).astype(jnp.float32),
                   bm2.astype(jnp.bfloat16).astype(jnp.float32))
    assert bool(jnp.allclose(got2, ref2, rtol=2e-2, atol=0.5)), "gemm tm512 mismatch"

    # Small config, structurally identical to resnet152 (which would be
    # base_width=64, blocks=(3, 8, 36, 3) at 224x224 inputs).
    base_width = 16
    blocks = (1, 1, 1, 1)
    params = init_resnet(jax.random.fold_in(key, 1),
                         base_width=base_width, blocks=blocks)
    x = jax.random.normal(jax.random.fold_in(key, 2), (2, 3, 32, 32),
                          dtype=jnp.float32)

    fwd = jax.jit(lambda xx: resnet_forward(xx, params))
    out = jax.block_until_ready(fwd(x))

    expected_c = base_width * 8 * 4   # last-stage width * bottleneck expansion
    assert out.shape == (2, expected_c, 1, 1), out.shape
    assert out.dtype == jnp.float32
    assert bool(jnp.all(jnp.isfinite(out)))
    print("KERNEL_OK")
</pallas_src>

<mosaic_0001>
module attributes {stable_mosaic.version = 11 : i64} {
  func.func @_gemm_epilogue_kernel(%arg0: i32, %arg1: i32, %arg2: i32, %arg3: memref<256x512xbf16, #tpu.memory_space<vmem>>, %arg4: memref<512x256xbf16, #tpu.memory_space<vmem>>, %arg5: memref<1x256xf32, #tpu.memory_space<vmem>>, %arg6: memref<256x256xbf16, #tpu.memory_space<vmem>>, %arg7: memref<256x256xbf16, #tpu.memory_space<vmem>>, %arg8: memref<256x256xf32, #tpu.memory_space<vmem>>) attributes {dimension_semantics = [#tpu.dimension_semantics<parallel>, #tpu.dimension_semantics<parallel>, #tpu.dimension_semantics<arbitrary>], iteration_bounds = array<i64: 2, 2, 2>, scalar_prefetch = 0 : i64, scratch_operands = 1 : i64, tpu.core_type = #tpu.core_type<tc>, window_params = [{transform_indices = @transform_0, window_bounds = array<i64: 256, 512>}, {transform_indices = @transform_1, window_bounds = array<i64: 512, 256>}, {transform_indices = @transform_2, window_bounds = array<i64: 1, 256>}, {transform_indices = @transform_3, window_bounds = array<i64: 256, 256>}, {transform_indices = @transform_4, window_bounds = array<i64: 256, 256>}]} {
    %c0_i32 = arith.constant 0 : i32
    %0 = arith.cmpi eq, %arg2, %c0_i32 : i32
    %1 = arith.extui %0 : i1 to i32
    %c0_i32_0 = arith.constant 0 : i32
    %2 = arith.cmpi ne, %1, %c0_i32_0 : i32
    scf.if %2 {
      %cst_9 = arith.constant 0.000000e+00 : f32
      %12 = vector.broadcast %cst_9 : f32 to vector<256x256xf32>
      %c0_10 = arith.constant 0 : index
      %c0_11 = arith.constant 0 : index
      %13 = vector.load %arg8[%c0_10, %c0_11] : memref<256x256xf32, #tpu.memory_space<vmem>>, vector<256x256xf32>
      tpu.vector_store %arg8[%c0_10, %c0_11], %12 {strides = array<i32>} : memref<256x256xf32, #tpu.memory_space<vmem>>, vector<256x256xf32>,
    } else {
    }
    %c0 = arith.constant 0 : index
    %c0_1 = arith.constant 0 : index
    %3 = vector.load %arg8[%c0, %c0_1] : memref<256x256xf32, #tpu.memory_space<vmem>>, vector<256x256xf32>
    %c0_2 = arith.constant 0 : index
    %c0_3 = arith.constant 0 : index
    %4 = vector.load %arg3[%c0_2, %c0_3] : memref<256x512xbf16, #tpu.memory_space<vmem>>, vector<256x512xbf16>
    %c0_4 = arith.constant 0 : index
    %c0_5 = arith.constant 0 : index
    %5 = vector.load %arg4[%c0_4, %c0_5] : memref<512x256xbf16, #tpu.memory_space<vmem>>, vector<512x256xbf16>
    %cst = arith.constant dense<0.000000e+00> : vector<256x256xf32>
    %6 = tpu.matmul %4, %5, %cst {dimension_numbers = #tpu.dot_dimension_numbers<[1], [0], [0], [1], [0, 0, 1, 1], [], []>} : vector<256x512xbf16>, vector<512x256xbf16>, vector<256x256xf32> -> vector<256x256xf32>
    %7 = arith.addf %3, %6 : vector<256x256xf32>
    %c0_6 = arith.constant 0 : index
    %c0_7 = arith.constant 0 : index
    %8 = vector.load %arg8[%c0_6, %c0_7] : memref<256x256xf32, #tpu.memory_space<vmem>>, vector<256x256xf32>
    tpu.vector_store %arg8[%c0_6, %c0_7], %7 {strides = array<i32>} : memref<256x256xf32, #tpu.memory_space<vmem>>, vector<256x256xf32>,
    %c1_i32 = arith.constant 1 : i32
    %9 = arith.cmpi eq, %arg2, %c1_i32 : i32
    %10 = arith.extui %9 : i1 to i32
    %c0_i32_8 = arith.constant 0 : i32
    %11 = arith.cmpi ne, %10, %c0_i32_8 : i32
    scf.if %11 {
      %c0_9 = arith.constant 0 : index
      %c0_10 = arith.constant 0 : index
      %12 = vector.load %arg8[%c0_9, %c0_10] : memref<256x256xf32, #tpu.memory_space<vmem>>, vector<256x256xf32>
      %c0_11 = arith.constant 0 : index
      %c0_12 = arith.constant 0 : index
      %13 = vector.load %arg5[%c0_11, %c0_12] : memref<1x256xf32, #tpu.memory_space<vmem>>, vector<1x256xf32>
      %14 = vector.broadcast %13 : vector<1x256xf32> to vector<256x256xf32>
      %15 = arith.addf %12, %14 : vector<256x256xf32>
      %c0_13 = arith.constant 0 : index
      %c0_14 = arith.constant 0 : index
      %16 = vector.load %arg6[%c0_13, %c0_14] : memref<256x256xbf16, #tpu.memory_space<vmem>>, vector<256x256xbf16>
      %17 = arith.extf %16 : vector<256x256xbf16> to vector<256x256xf32>
      %18 = arith.addf %15, %17 : vector<256x256xf32>
      %cst_15 = arith.constant 0.000000e+00 : f32
      %19 = vector.broadcast %cst_15 : f32 to vector<256x256xf32>
      %20 = arith.maximumf %18, %19 : vector<256x256xf32>
      %21 = arith.truncf %20 : vector<256x256xf32> to vector<256x256xbf16>
      %c0_16 = arith.constant 0 : index
      %c0_17 = arith.constant 0 : index
      %22 = vector.load %arg7[%c0_16, %c0_17] : memref<256x256xbf16, #tpu.memory_space<vmem>>, vector<256x256xbf16>
      tpu.vector_store %arg7[%c0_16, %c0_17], %21 {strides = array<i32>} : memref<256x256xbf16, #tpu.memory_space<vmem>>, vector<256x256xbf16>,
    } else {
    }
    return
  }
  func.func @transform_0(%arg0: i32, %arg1: i32, %arg2: i32) -> (i32, i32) {
    %c0_i32 = arith.constant 0 : i32
    return %arg0, %arg2 : i32, i32
  }
  func.func @transform_1(%arg0: i32, %arg1: i32, %arg2: i32) -> (i32, i32) {
    %c0_i32 = arith.constant 0 : i32
    return %arg2, %arg1 : i32, i32
  }
  func.func @transform_2(%arg0: i32, %arg1: i32, %arg2: i32) -> (i32, i32) {
    %c0_i32 = arith.constant 0 : i32
    %c0_i32_0 = arith.constant 0 : i32
    return %c0_i32, %arg1 : i32, i32
  }
  func.func @transform_3(%arg0: i32, %arg1: i32, %arg2: i32) -> (i32, i32) {
    %c0_i32 = arith.constant 0 : i32
    return %arg0, %arg1 : i32, i32
  }
  func.func @transform_4(%arg0: i32, %arg1: i32, %arg2: i32) -> (i32, i32) {
    %c0_i32 = arith.constant 0 : i32
    return %arg0, %arg1 : i32, i32
  }
}

</mosaic_0001>

<bundles_post_ra>
// kernel: tpu_custom_call.1
= control target key start
LH: loop header
LB: loop body
LE: loop exit
PB: predicated region body
PF: predicated region fallthrough
CT: control target
= control target key end

     0   :  { %s4286_s0 = inlined_call_operand.hbm [shape: bf16[512,1024], index: 0, kind: input, shape index: {}]   ;;  %s4287_s1 = inlined_call_operand.hbm [shape: bf16[1024,512], index: 1, kind: input, shape index: {}]   ;;  %s4288_s2 = inlined_call_operand.vmem [shape: f32[1,512], index: 2, kind: input, shape index: {}]   ;;  %s4289_s3 = inlined_call_operand.hbm [shape: bf16[512,512], index: 3, kind: input, shape index: {}]   ;;  %s4290_s4 = inlined_call_operand.hbm [shape: bf16[512,512], index: 4, kind: output, shape index: {}]  }
   0x1   :  { %4309 = sst [smem:[#allocation24_spill]] %s4286_s0 }
   0x2   :  { %4310 = sst [smem:[#allocation25_spill]] %s4287_s1 }
   0x3   :  { %4311 = sst [smem:[#allocation26_spill]] %s4288_s2 }
   0x4   :  { %4312 = sst [smem:[#allocation27_spill]] %s4290_s4 }
   0x5   :  { %9 = vsyncpa [#allocation4], 0 }
   0x6   :  { %11 = vsyncpa [#allocation4 + $0x1], 0 }
   0x7   :  { %12 = vsyncpa [#allocation7], 0 }
   0x8   :  { %14 = vsyncpa [#allocation7 + $0x1], 0 }
   0x9   :  { %15 = vsyncpa [#allocation5], 0 }
   0xa   :  { %17 = vsyncpa [#allocation5 + $0x1], 0  ;;  %s3480_s15 = smov 0   ;;  %s3482_s16 = smov 0  }
   0xb   :  { %s3484_s17 = smov 0   ;;  %s3486_s18 = smov 0  }
   0xc   :  { %s3488_s19 = smov 0   ;;  %s3490_s20 = smov 0  }
   0xd   :  { %s3492_s21 = smov 0   ;;  %s3494_s22 = smov 0  }
   0xe   :  { %s3496_s23 = smov 0   ;;  %s3498_s24 = smov 0  }
   0xf   :  { %s3500_s25 = smov 0   ;;  %s3502_s26 = smov 0  }
  0x10   :  { %s3504_s27 = smov 0   ;;  %s3506_s28 = smov 0  }
  0x11   :  { %s3508_s29 = smov 0   ;;  %s3510_s30 = smov 0  }
  0x12 LB: > { %4313 = sst [smem:[#allocation14_spill]] %s3396_s19  ;;  %s35_s5 = sadd.s32 1, %s3428_s27  ;;  %s3440_s30 = sphi %s3510_s30, %s23_s30   ;;  %s3436_s29 = sphi %s3508_s29, %s4383_s29   ;;  %s3432_s28 = sphi %s3506_s28, %s4382_s28   ;;  %s3428_s27 = sphi %s3504_s27, %s4381_s27   ;;  %s3424_s26 = sphi %s3502_s26, %s4366_s26   ;;  %s3420_s25 = sphi %s3500_s25, %s4380_s25   ;;  %s3416_s24 = sphi %s3498_s24, %s4379_s24   ;;  %s3412_s23 = sphi %s3496_s23, %s4378_s23   ;;  %s3408_s22 = sphi %s3494_s22, %s4377_s22   ;;  %s3404_s21 = sphi %s3492_s21, %s4376_s21   ;;  %s3400_s20 = sphi %s3490_s20, %s4375_s20   ;;  %s3396_s19 = sphi %s3488_s19, %s4374_s19   ;;  %s3392_s18 = sphi %s3486_s18, %s4364_s18   ;;  %s3388_s17 = sphi %s3484_s17, %s4373_s17   ;;  %s3384_s16 = sphi %s3482_s16, %s4372_s16   ;;  %s3380_s15 = sphi %s3480_s15, %s4370_s15  }
  0x13   : > { %4314 = sst [smem:[#allocation15_spill]] %s3416_s24  ;;  %p36_p0 = scmp.ge.s32.totalorder %s35_s5, 2 }
  0x14   : > { %4315 = sst [smem:[#allocation16_spill]] %s3420_s25  ;;  %s38_s6 = sadd.s32 1, %s3432_s28 }
  0x15   : > { %4316 = sst [smem:[#allocation17_spill]] %s3424_s26  ;;  %s3563_s7 = sadd.s32 4294967295, %s3440_s30  }
  0x16   : > { %4317 = sst [smem:[#allocation18_spill]] %s3436_s29  ;;  %s42_s8 = sadd.s32 1, %s3436_s29 }
  0x17   : > { %s4385_s5 = smov (%p36_p0, %s35_s5), 0  ;;  %s4387_s6 = smov (!%p36_p0, %s38_s6), %s3432_s28 }
  0x18   : > { %4318 = sst [smem:[#allocation19_spill]] %s4385_s5  ;;  %s47_s9 = ssub.s32 %s3428_s27, %s4385_s5 }
  0x19   : > { %p4300_p1 = scmp.eq.s32.totalorder %s3440_s30, 0  ;;  %p40_p2 = scmp.ge.s32.totalorder %s4387_s6, 2 }
  0x1a   : > { %p4299_p3 = scmp.eq.s32.totalorder %s3563_s7, 0  ;;  %s79_s10 = sadd.s32 1, %s3400_s20 }
  0x1b   : > { %p92_p4 = scmp.ne.s32.totalorder %s3396_s19, %s3392_s18  ;;  %s4389_s6 = smov (%p40_p2, %s4387_s6), 0 }
  0x1c   : > { %4319 = sst [smem:[#allocation20_spill]] %s4389_s6  ;;  %s4391_s8 = smov (!%p40_p2, %s42_s8), %s3436_s29 }
  0x1d   : > { %s3581_s11 = ssub.s32 %s3432_s28, %s4389_s6  ;;  %p86_p5 = scmp.ne.s32.totalorder %s3400_s20, %s3396_s19 }
  0x1e   : > { %p44_p6 = scmp.ge.s32.totalorder %s4391_s8, 2  ;;  %s76_s12 = sor.u32 %s3581_s11, %s47_s9 }
  0x1f   : > { %p77_p7 = scmp.eq.s32.totalorder %s76_s12, 0  ;;  %p3588_p8 = por %p92_p4, %p4299_p3 }
  0x20   : > { %s4393_s8 = smov (%p44_p6, %s4391_s8), 0  ;;  %p3604_p9 = por %p86_p5, %p4300_p1 }
  0x21   : > { %s4320_s13 = scalar_select %p3588_p8, 1, 0 }
  0x22   : > { %4322 = sst [smem:[#allocation22_spill]] %s4393_s8  ;;  %s3599_s18 = ssub.s32 %s3436_s29, %s4393_s8 }
  0x23   : > { %4321 = sst [smem:[#allocation21_spill]] %s4320_s13  ;;  %s48_s6 = sor.u32 %s47_s9, %s3599_s18 }
  0x24   : > { %s3595_s14 = scalar_select %p77_p7, %s3400_s20, %s79_s10  }
  0x25   : > { %p3608_p10 = scmp.eq.s32.totalorder %s48_s6, 0  ;;  %p4298_p11 = scmp.lt.s32.totalorder %s3440_s30, 8 }
  0x26   : > { %4323 = sst [smem:[#allocation23_spill]] %s3595_s14  ;;  %s222_s10 = sand.u32 1, %s3440_s30  }
  0x27   : > { %s224_s14 = sand.u32 1, %s3400_s20   ;;  %s2544_s26 = sshll.u32 %s3432_s28, 1 }
  0x28   : > { %s2542_s8 = sshll.u32 %s224_s14, 9  ;;  %s2728_s24 = sshll.u32 %s3428_s27, 8 }
  0x29   : > { %s226_s2 = scalar_lea.vmem [#allocation6], %s2542_s8  ;;  %s233_s9 = sadd.s32 %s2728_s24, %s2544_s26 }
  0x2a   : > { %s236_s25 = sshll.u32 %s226_s2, 4  ;;  %s2546_s13 = sshll.u32 %s233_s9, 6  ;;  %s3621_s25 = int_to_ptr.vmem [resolvable:$true] %s236_s25 }
  0x2b   : > { %p3627_p12 = pnand %p4298_p11, %p3604_p9  ;;  %s4327_s1 = sld [smem:[#allocation25_spill]] }
  0x2c   : > { %s3636_s2 = scalar_lea.sflag [#allocation7], %s222_s10 }
  0x2d   : > { %p3182_p0 = pneg %p3627_p12 }
  0x31   : > { %s3634_s14 = scalar_lea.hbm %s4327_s1, %s2546_s13  ;;  %s3185_s19 = scalar_lea.hbm %s4327_s1, 32768 }
  0x32   : > { %s3180_s24 = scalar_lea.hbm %s3634_s14, 8192  ;;  %p3186_p5 = scmp.lt.u32.totalorder %s3634_s14, %s4327_s1 }
  0x33   : > { %p3181_p13 = scmp.ne.s32.totalorder %s3634_s14, %s3180_s24  ;;  %p3187_p6 = scmp.lt.u32.totalorder %s3185_s19, %s3180_s24 }
  0x34   : > { %p3189_p9 = scmp.lt.u32.totalorder %s3180_s24, %s3634_s14 }
  0x35   : > { %p3183_p2 = pnand %p3182_p0, %p3181_p13  ;;  %p3188_p7 = por %p3187_p6, %p3186_p5 }
  0x37   : > { %p3184_p4 = pneg %p3183_p2  ;;  %p3190_p11 = por %p3189_p9, %p3188_p7 }
  0x39   : > { %p3191_p3 = pnand %p3190_p11, %p3184_p4 }
  0x3b   : > { %3194 = shalt.err (!%p3191_p3)
}
  0x3c   : > { %s3195_s10 = scalar_lea.vmem %s3621_s25, 8192  ;;  %s3442_s9 = smov [#allocation6]  }
  0x3d   : > { %p3196_p13 = scmp.ne.s32.totalorder %s3621_s25, %s3195_s10  ;;  %s3200_s8 = sshll.u32 %s3442_s9, 4  ;;  %s3201_s8 = int_to_ptr.vmem [resolvable:$false] %s3200_s8 }
  0x3e   : > { %s3202_s4 = scalar_lea.vmem %s3201_s8, 16384  ;;  %p3203_p8 = scmp.lt.s32.totalorder %s3621_s25, %s3201_s8 }
  0x3f   : > { %p3198_p2 = pnand %p3196_p13, %p3182_p0  ;;  %p3204_p5 = scmp.lt.s32.totalorder %s3202_s4, %s3195_s10 }
  0x41   : > { %p3199_p1 = pneg %p3198_p2  ;;  %p3205_p6 = por %p3204_p5, %p3203_p8 }
  0x43   : > { %p3206_p7 = pnand %p3205_p6, %p3199_p1 }
  0x45   : > { %3209 = shalt.err (!%p3206_p7)
}
  0x46   : > { %s4304_s24 = smov 256   ;;  %s4302_s19 = smov 128  }
  0x47   : > { %s4303_s13 = smov 8   ;;  %s2729_s12 = sshll.u32 %s3436_s29, 7 }
  0x48   : > { %2841 = dma.hbm_to_vmem [thread:$0]  (!%p3627_p12), %s3634_s14, 8192, %s3621_s25, %s3636_s2, %s4304_s24, %s4302_s19, %s4303_s13  }
  0x49   : > { %p2552_p1 = scmp.ge.s32.totalorder %s3440_s30, 1  ;;  %s3671_s10 = sadd.s32 %s2729_s12, %s2544_s26 }
  0x4a   : > { %p276_p3 = scmp.lt.s32.totalorder %s3440_s30, 9  ;;  %s4328_s9 = sor.u32 %s3581_s11, %s3599_s18 }
  0x4b   : > { %p3677_p8 = scmp.eq.s32.totalorder %s4328_s9, 0  ;;  %s51_s1 = sadd.s32 1, %s3412_s23 }
  0x4c   : > { %p3682_p11 = pnand %p2552_p1, %p276_p3  ;;  %p58_p12 = scmp.ne.s32.totalorder %s3412_s23, %s3408_s22 }
  0x4d   : > { %s3690_s25 = scalar_select %p3608_p10, %s3412_s23, %s51_s1  }
  0x4e   : > { %s4330_s6 = scalar_select %p3682_p11, 1, 0 }
  0x4f   : > { %p64_p0 = scmp.ne.s32.totalorder %s3408_s22, %s3404_s21  ;;  %s198_s26 = sand.u32 1, %s3412_s23  }
  0x50   : > { %s2539_s14 = sshll.u32 %s3428_s27, 2  ;;  %p4331_p4 = scmp.eq.s32.totalorder %s3440_s30, 0 }
  0x51   : > { %p4332_p13 = scmp.eq.s32.totalorder %s3563_s7, 0  ;;  %s2537_s18 = sshll.u32 %s198_s26, 9 }
  0x52   : > { %p60_p9 = por %p4331_p4, %p58_p12  ;;  %s2727_s12 = sshll.u32 %s3436_s29, 8 }
  0x53   : > { %p3702_p2 = por %p4332_p13, %p64_p0  ;;  %s209_s9 = sadd.s32 %s2727_s12, %s2539_s14 }
  0x54   : > { %s202_s19 = scalar_lea.vmem [#allocation3], %s2537_s18  ;;  %s2541_s5 = sshll.u32 %s209_s9, 6 }
  0x55   : > { %s4333_s11 = scalar_select %p3702_p2, 1, 0 }
  0x56   : > { %s212_s13 = sshll.u32 %s202_s19, 4  ;;  %s4334_s0 = sld [smem:[#allocation24_spill]]  ;;  %s3707_s13 = int_to_ptr.vmem [resolvable:$true] %s212_s13 }
  0x57   : > { %p4335_p10 = scmp.lt.s32.totalorder %s3440_s30, 8  ;;  %s3720_s19 = scalar_lea.sflag [#allocation4], %s198_s26 }
  0x59   : > { %p3716_p5 = pnand %p4335_p10, %p60_p9 }
  0x5b   : > { %p3212_p7 = pneg %p3716_p5 }
  0x5c   : > { %s3712_s21 = scalar_lea.hbm %s4334_s0, %s2541_s5  ;;  %s3215_s12 = scalar_lea.hbm %s4334_s0, 32768 }
  0x5d   : > { %s3210_s14 = scalar_lea.hbm %s3712_s21, 8192  ;;  %p3216_p12 = scmp.lt.u32.totalorder %s3712_s21, %s4334_s0 }
  0x5e   : > { %p3211_p6 = scmp.ne.s32.totalorder %s3712_s21, %s3210_s14  ;;  %p3217_p0 = scmp.lt.u32.totalorder %s3215_s12, %s3210_s14 }
  0x5f   : > { %p3219_p9 = scmp.lt.u32.totalorder %s3210_s14, %s3712_s21 }
  0x60   : > { %p3213_p1 = pnand %p3212_p7, %p3211_p6  ;;  %p3218_p4 = por %p3217_p0, %p3216_p12 }
  0x62   : > { %p3214_p3 = pneg %p3213_p1  ;;  %p3220_p13 = por %p3219_p9, %p3218_p4 }
  0x64   : > { %p3221_p10 = pnand %p3220_p13, %p3214_p3 }
  0x66   : > { %3224 = shalt.err (!%p3221_p10)
}
  0x67   : > { %s3225_s26 = scalar_lea.vmem %s3707_s13, 8192  ;;  %s3446_s1 = smov [#allocation3]  }
  0x68   : > { %p3226_p6 = scmp.ne.s32.totalorder %s3707_s13, %s3225_s26  ;;  %s3230_s4 = sshll.u32 %s3446_s1, 4  ;;  %s3231_s4 = int_to_ptr.vmem [resolvable:$false] %s3230_s4 }
  0x69   : > { %s3232_s18 = scalar_lea.vmem %s3231_s4, 16384  ;;  %p3233_p11 = scmp.lt.s32.totalorder %s3707_s13, %s3231_s4 }
  0x6a   : > { %p3228_p1 = pnand %p3226_p6, %p3212_p7  ;;  %p3234_p12 = scmp.lt.s32.totalorder %s3232_s18, %s3225_s26 }
  0x6c   : > { %p3229_p2 = pneg %p3228_p1  ;;  %p3235_p0 = por %p3234_p12, %p3233_p11 }
  0x6e   : > { %p3236_p4 = pnand %p3235_p0, %p3229_p2 }
  0x70   : > { %3239 = shalt.err (!%p3236_p4)
}
  0x71   : > { %s3447_s14 = smov 512   ;;  %s3448_s12 = smov 16  }
  0x72   : > { %s4337_s9 = smov 256   ;;  %s2534_s5 = sadd.s32 4294967294, %s3440_s30  }
  0x73   : > { %2838 = dma.hbm_to_vmem [thread:$0]  (!%p3716_p5), %s3712_s21, 8192, %s3707_s13, %s3720_s19, %s3447_s14, %s4337_s9, %s3448_s12  }
  0x74   : > { %s133_s26 = sadd.s32 1, %s3388_s17  ;;  %p140_p11 = scmp.ne.s32.totalorder %s3388_s17, %s3384_s16 }
  0x75   : > { %s3756_s1 = scalar_select %p3677_p8, %s3388_s17, %s133_s26  }
  0x76   : > { %p4338_p2 = scmp.eq.s32.totalorder %s3440_s30, 0  ;;  %p146_p3 = scmp.ne.s32.totalorder %s3384_s16, %s3380_s15 }
  0x77   : > { %p172_p9 = scmp.eq.s32.totalorder %s3563_s7, 7  ;;  %p178_p13 = scmp.eq.s32.totalorder %s2534_s5, 7 }
  0x78   : > { %p142_p7 = por %p140_p11, %p4338_p2  ;;  %p4339_p10 = scmp.eq.s32.totalorder %s3563_s7, 0 }
  0x79   : > { %s256_s24 = sand.u32 1, %s3388_s17   ;;  %p3770_p1 = por %p172_p9, %p140_p11 }
  0x7a   : > { %p3765_p6 = por %p146_p3, %p4339_p10  ;;  %p3774_p5 = por %p178_p13, %p146_p3 }
  0x7b   : > { %s4341_s18 = scalar_select %p3770_p1, 1, 0 }
  0x7c   : > { %s4342_s13 = scalar_select %p3774_p5, 1, 0 }
  0x7d   : > { %s2547_s8 = sshll.u32 %s256_s24, 8  ;;  %p4343_p8 = scmp.lt.s32.totalorder %s3440_s30, 8 }
  0x7e   : > { %s4345_s19 = sshll.u32 %s3671_s10, 6  ;;  %s258_s26 = scalar_lea.vmem [#allocation8], %s2547_s8 }
  0x7f   : > { %p3780_p12 = pnand %p4343_p8, %p142_p7  ;;  %s3789_s5 = scalar_lea.hbm %s4289_s3, %s4345_s19 }
  0x80   : > { %s268_s0 = sshll.u32 %s258_s26, 4  ;;  %s3240_s24 = scalar_lea.hbm %s3789_s5, 4096  ;;  %s3791_s0 = int_to_ptr.vmem [resolvable:$true] %s268_s0 }
  0x81   : > { %p3241_p0 = scmp.ne.s32.totalorder %s3789_s5, %s3240_s24  ;;  %p3242_p4 = pneg %p3780_p12 }
  0x82   : > { %s3245_s19 = scalar_lea.hbm %s4289_s3, 16384  ;;  %p3246_p7 = scmp.lt.u32.totalorder %s3789_s5, %s4289_s3 }
  0x83   : > { %p3243_p11 = pnand %p3242_p4, %p3241_p0  ;;  %p3247_p3 = scmp.lt.u32.totalorder %s3245_s19, %s3240_s24 }
  0x84   : > { %p3249_p13 = scmp.lt.u32.totalorder %s3240_s24, %s3789_s5 }
  0x85   : > { %p3244_p2 = pneg %p3243_p11  ;;  %p3248_p9 = por %p3247_p3, %p3246_p7 }
  0x87   : > { %p3250_p10 = por %p3249_p13, %p3248_p9 }
  0x89   : > { %p3251_p8 = pnand %p3250_p10, %p3244_p2 }
  0x8b   : > { %3254 = shalt.err (!%p3251_p8)
}
  0x8c   : > { %s3255_s8 = scalar_lea.vmem %s3791_s0, 4096  ;;  %s3449_s26 = smov [#allocation8]  }
  0x8d   : > { %p3256_p0 = scmp.ne.s32.totalorder %s3791_s0, %s3255_s8  ;;  %s3260_s10 = sshll.u32 %s3449_s26, 4  ;;  %s3261_s10 = int_to_ptr.vmem [resolvable:$false] %s3260_s10 }
  0x8e   : > { %s3262_s29 = scalar_lea.vmem %s3261_s10, 8192  ;;  %p3263_p1 = scmp.lt.s32.totalorder %s3791_s0, %s3261_s10 }
  0x8f   : > { %p3258_p11 = pnand %p3256_p0, %p3242_p4  ;;  %p3264_p7 = scmp.lt.s32.totalorder %s3262_s29, %s3255_s8 }
  0x91   : > { %p3259_p5 = pneg %p3258_p11  ;;  %p3265_p3 = por %p3264_p7, %p3263_p1 }
  0x93   : > { %p3266_p9 = pnand %p3265_p3, %p3259_p5 }
  0x95   : > { %3269 = shalt.err (!%p3266_p9)
}
  0x96   : > { %s4346_s24 = smov 8   ;;  %s4347_s14 = smov 128  }
  0x97   : > { %2844 = dma.hbm_to_vmem [thread:$0]  (!%p3780_p12), %s3789_s5, 4096, %s3791_s0, %s3636_s2, %s4337_s9, %s4347_s14, %s4346_s24  }
  0x98   : > { %p4348_p4 = scmp.ne.s32.totalorder %s4330_s6, 0 }
  0x99   : > { %s282_s19 = sand.u32 (!%p4348_p4), 1, %s3408_s22   ;;  %p4349_p1 = scmp.ne.s32.totalorder (!%p4348_p4), %s4333_s11, 0 }
  0x9a   : > { %280 = sbr.rel (%p4348_p4) target bundleno = 723 (0x2d3), region = 36  ;;  %s2553_s12 = sshll.u32 (!%p4348_p4), %s282_s19, 9 }
  0x9b   : > { %s283_s8 = scalar_lea.sflag (!%p4348_p4), [#allocation4], %s282_s19  ;;  %s3825_s26 = scalar_lea.vmem (!%p4348_p4), [#allocation3], %s2553_s12 }
  0xa1   : > { %3363 = dma.done.wait (%p4349_p1), %s283_s8, 8192  }
  0xa2   : > { %3365 = vsyncadd (%p4349_p1), %s283_s8, 4294959104  ;;  %s4350_s21 = sld [smem:[#allocation14_spill]]  ;;  %s4351_s10 = sld [smem:[#allocation21_spill]] }
  0xa3   : > { %s291_s29 = sand.u32 1, %s3563_s7  }
  0xa4   : > { %s292_s6 = scalar_lea.sflag [#allocation7], %s291_s29 }
  0xa8   : > { %s293_s0 = sand.u32 1, %s4350_s21   ;;  %p4352_p5 = scmp.ne.s32.totalorder %s4351_s10, 0 }
  0xa9   : > { %s2554_s2 = sshll.u32 %s293_s0, 9 }
  0xaa   : > { %s3833_s9 = scalar_lea.vmem [#allocation6], %s2554_s2 }
  0xab   : > { %3367 = dma.done.wait (%p4352_p5), %s292_s6, 8192  }
  0xac   : > { %3369 = vsyncadd (%p4352_p5), %s292_s6, 4294959104  ;;  %s302_s5 = sand.u32 1, %s3384_s16  }
  0xad   : > { %s2555_s11 = sshll.u32 %s302_s5, 8 }
  0xae   : > { %s3842_s24 = scalar_lea.vmem [#allocation8], %s2555_s11 }
  0xaf   : > { %3371 = dma.done.wait (%p3765_p6), %s292_s6, 4096  }
  0xb0   : > { %3373 = vsyncadd (%p3765_p6), %s292_s6, 4294963200  ;;  %s4353_s7 = sld [smem:[#allocation16_spill]]  ;;  %s4354_s21 = sld [smem:[#allocation26_spill]] }
  0xb1   : > { %s3859_s29 = scalar_lea.vmem [#allocation9], %s2555_s11  ;;  %s4355_s0 = sld [smem:[#allocation15_spill]] }
  0xb6   : > { %s3849_s14 = sshll.u32 %s4353_s7, 1 }
  0xb7   : > { %p348_p12 = scmp.lt.s32.totalorder %s3849_s14, 3  ;;  %p2558_p2 = scmp.ne.s32.totalorder %s4355_s0, 0 }
  0xb8   : > { %v3450_v0 = vmov (!%p2558_p2), 0.0  }
  0xb9   : > { %s3853_s19 = scalar_select %p348_p12, %s3849_s14, 3 }
  0xba   : > { %359 = sbr.rel (%p2558_p2) target bundleno = 218 (0xda), region = 52  ;;  %360 = vst [vmem:[#allocation2] sm:$0xff] (!%p2558_p2), %v3450_v0  ;;  %361 = vst [vmem:[#allocation2 + $0x8] sm:$0xff] (!%p2558_p2), %v3450_v0 }
  0xbb   : > { %s350_s10 = scalar_lea.vmem %s4354_s21, %s3853_s19  ;;  %362 = vst [vmem:[#allocation2 + $0x10] sm:$0xff] (!%p2558_p2), %v3450_v0  ;;  %363 = vst [vmem:[#allocation2 + $0x18] sm:$0xff] (!%p2558_p2), %v3450_v0 }
  0xbc   : > { %364 = vst [vmem:[#allocation2 + $0x20] sm:$0xff] (!%p2558_p2), %v3450_v0  ;;  %365 = vst [vmem:[#allocation2 + $0x28] sm:$0xff] (!%p2558_p2), %v3450_v0 }
  0xbd   : > { %366 = vst [vmem:[#allocation2 + $0x30] sm:$0xff] (!%p2558_p2), %v3450_v0  ;;  %367 = vst [vmem:[#allocation2 + $0x38] sm:$0xff] (!%p2558_p2), %v3450_v0 }
  0xbe   : > { %368 = vst [vmem:[#allocation2 + $0x40] sm:$0xff] (!%p2558_p2), %v3450_v0  ;;  %369 = vst [vmem:[#allocation2 + $0x48] sm:$0xff] (!%p2558_p2), %v3450_v0 }
  0xbf   : > { %370 = vst [vmem:[#allocation2 + $0x50] sm:$0xff] (!%p2558_p2), %v3450_v0  ;;  %371 = vst [vmem:[#allocation2 + $0x58] sm:$0xff] (!%p2558_p2), %v3450_v0 }
  0xc0   : > { %372 = vst [vmem:[#allocation2 + $0x60] sm:$0xff] (!%p2558_p2), %v3450_v0  ;;  %373 = vst [vmem:[#allocation2 + $0x68] sm:$0xff] (!%p2558_p2), %v3450_v0 }
  0xc1   : > { %374 = vst [vmem:[#allocation2 + $0x70] sm:$0xff] %v3450_v0  ;;  %375 = vst [vmem:[#allocation2 + $0x78] sm:$0xff] %v3450_v0 }
  0xc2   : > { %376 = vst [vmem:[#allocation2 + $0x80] sm:$0xff] %v3450_v0  ;;  %377 = vst [vmem:[#allocation2 + $0x88] sm:$0xff] %v3450_v0 }
  0xc3   : > { %378 = vst [vmem:[#allocation2 + $0x90] sm:$0xff] %v3450_v0  ;;  %379 = vst [vmem:[#allocation2 + $0x98] sm:$0xff] %v3450_v0 }
  0xc4   : > { %380 = vst [vmem:[#allocation2 + $0xa0] sm:$0xff] %v3450_v0  ;;  %381 = vst [vmem:[#allocation2 + $0xa8] sm:$0xff] %v3450_v0 }
  0xc5   : > { %382 = vst [vmem:[#allocation2 + $0xb0] sm:$0xff] %v3450_v0  ;;  %383 = vst [vmem:[#allocation2 + $0xb8] sm:$0xff] %v3450_v0 }
  0xc6   : > { %384 = vst [vmem:[#allocation2 + $0xc0] sm:$0xff] %v3450_v0  ;;  %385 = vst [vmem:[#allocation2 + $0xc8] sm:$0xff] %v3450_v0 }
  0xc7   : > { %386 = vst [vmem:[#allocation2 + $0xd0] sm:$0xff] %v3450_v0  ;;  %387 = vst [vmem:[#allocation2 + $0xd8] sm:$0xff] %v3450_v0 }
  0xc8   : > { %388 = vst [vmem:[#allocation2 + $0xe0] sm:$0xff] %v3450_v0  ;;  %389 = vst [vmem:[#allocation2 + $0xe8] sm:$0xff] %v3450_v0 }
  0xc9   : > { %390 = vst [vmem:[#allocation2 + $0xf0] sm:$0xff] %v3450_v0  ;;  %391 = vst [vmem:[#allocation2 + $0xf8] sm:$0xff] %v3450_v0 }
  0xca   : > { %392 = vst [vmem:[#allocation2 + $0x100] sm:$0xff] %v3450_v0  ;;  %393 = vst [vmem:[#allocation2 + $0x108] sm:$0xff] %v3450_v0 }
  0xcb   : > { %394 = vst [vmem:[#allocation2 + $0x110] sm:$0xff] %v3450_v0  ;;  %395 = vst [vmem:[#allocation2 + $0x118] sm:$0xff] %v3450_v0 }
  0xcc   : > { %396 = vst [vmem:[#allocation2 + $0x120] sm:$0xff] %v3450_v0  ;;  %397 = vst [vmem:[#allocation2 + $0x128] sm:$0xff] %v3450_v0 }
  0xcd   : > { %398 = vst [vmem:[#allocation2 + $0x130] sm:$0xff] %v3450_v0  ;;  %399 = vst [vmem:[#allocation2 + $0x138] sm:$0xff] %v3450_v0 }
  0xce   : > { %400 = vst [vmem:[#allocation2 + $0x140] sm:$0xff] %v3450_v0  ;;  %401 = vst [vmem:[#allocation2 + $0x148] sm:$0xff] %v3450_v0 }
  0xcf   : > { %402 = vst [vmem:[#allocation2 + $0x150] sm:$0xff] %v3450_v0  ;;  %403 = vst [vmem:[#allocation2 + $0x158] sm:$0xff] %v3450_v0 }
  0xd0   : > { %404 = vst [vmem:[#allocation2 + $0x160] sm:$0xff] %v3450_v0  ;;  %405 = vst [vmem:[#allocation2 + $0x168] sm:$0xff] %v3450_v0 }
  0xd1   : > { %406 = vst [vmem:[#allocation2 + $0x170] sm:$0xff] %v3450_v0  ;;  %407 = vst [vmem:[#allocation2 + $0x178] sm:$0xff] %v3450_v0 }
  0xd2   : > { %408 = vst [vmem:[#allocation2 + $0x180] sm:$0xff] %v3450_v0  ;;  %409 = vst [vmem:[#allocation2 + $0x188] sm:$0xff] %v3450_v0 }
  0xd3   : > { %410 = vst [vmem:[#allocation2 + $0x190] sm:$0xff] %v3450_v0  ;;  %411 = vst [vmem:[#allocation2 + $0x198] sm:$0xff] %v3450_v0 }
  0xd4   : > { %412 = vst [vmem:[#allocation2 + $0x1a0] sm:$0xff] %v3450_v0  ;;  %413 = vst [vmem:[#allocation2 + $0x1a8] sm:$0xff] %v3450_v0 }
  0xd5   : > { %414 = vst [vmem:[#allocation2 + $0x1b0] sm:$0xff] %v3450_v0  ;;  %415 = vst [vmem:[#allocation2 + $0x1b8] sm:$0xff] %v3450_v0 }
  0xd6   : > { %416 = vst [vmem:[#allocation2 + $0x1c0] sm:$0xff] %v3450_v0  ;;  %417 = vst [vmem:[#allocation2 + $0x1c8] sm:$0xff] %v3450_v0 }
  0xd7   : > { %418 = vst [vmem:[#allocation2 + $0x1d0] sm:$0xff] %v3450_v0  ;;  %419 = vst [vmem:[#allocation2 + $0x1d8] sm:$0xff] %v3450_v0 }
  0xd8   : > { %420 = vst [vmem:[#allocation2 + $0x1e0] sm:$0xff] %v3450_v0  ;;  %421 = vst [vmem:[#allocation2 + $0x1e8] sm:$0xff] %v3450_v0 }
  0xd9   : > { %422 = vst [vmem:[#allocation2 + $0x1f0] sm:$0xff] %v3450_v0  ;;  %423 = vst [vmem:[#allocation2 + $0x1f8] sm:$0xff] %v3450_v0 }
  0xda PF: > { %v2988_v1 = vld [vmem:[%s3833_s9 + $0x4] ss:$8 sps:$4 sm:$0xff]   ;;  %v2992_v3 = vld [vmem:[%s3833_s9] ss:$8 sps:$4 sm:$0xff]   ;;  %v2994_v5 = vld [vmem:[%s3833_s9 + $0x14] ss:$8 sps:$4 sm:$0xff]  }
  0xdb   : > { %v2990_v2 = vld [vmem:[%s3833_s9 + $0x104] ss:$8 sps:$4 sm:$0xff]   ;;  %1256 = vmatprep.subr.bf16.mxu1 %v2988_v1  ;;  %v2993_v4 = vld [vmem:[%s3833_s9 + $0x100] ss:$8 sps:$4 sm:$0xff]   ;;  %v2996_v6 = vld [vmem:[%s3833_s9 + $0x114] ss:$8 sps:$4 sm:$0xff]  }
  0xdc   : > { %1449 = vmatprep.subr.bf16.mxu0 %v2990_v2  ;;  %1257 = vmatpush1.bf16.msra.mxu1 %v2992_v3  ;;  %v2998_v7 = vld [vmem:[%s3833_s9 + $0x10] ss:$8 sps:$4 sm:$0xff]   ;;  %v3000_v9 = vld [vmem:[%s3833_s9 + $0x24] ss:$8 sps:$4 sm:$0xff]   ;;  %v3004_v11 = vld [vmem:[%s3833_s9 + $0x20] ss:$8 sps:$4 sm:$0xff]  }
  0xdd   : > { %1450 = vmatpush1.bf16.msra.mxu0 %v2993_v4  ;;  %1258 = vmatprep.subr.bf16.mxu1 %v2994_v5  ;;  %v2999_v8 = vld [vmem:[%s3833_s9 + $0x110] ss:$8 sps:$4 sm:$0xff]   ;;  %v3002_v10 = vld [vmem:[%s3833_s9 + $0x124] ss:$8 sps:$4 sm:$0xff]   ;;  %v3005_v12 = vld [vmem:[%s3833_s9 + $0x120] ss:$8 sps:$4 sm:$0xff]  }
  0xde   : > { %1451 = vmatprep.subr.bf16.mxu0 %v2996_v6  ;;  %v3006_v13 = vld [vmem:[%s3833_s9 + $0x34] ss:$8 sps:$4 sm:$0xff]   ;;  %v3010_v15 = vld [vmem:[%s3833_s9 + $0x30] ss:$8 sps:$4 sm:$0xff]   ;;  %v3012_v17 = vld [vmem:[%s3833_s9 + $0x44] ss:$8 sps:$4 sm:$0xff]  }
  0xdf   : > { %v3008_v14 = vld [vmem:[%s3833_s9 + $0x134] ss:$8 sps:$4 sm:$0xff]   ;;  %v3011_v16 = vld [vmem:[%s3833_s9 + $0x130] ss:$8 sps:$4 sm:$0xff]   ;;  %v3014_v18 = vld [vmem:[%s3833_s9 + $0x144] ss:$8 sps:$4 sm:$0xff]  }
  0xe0   : > { %1259 = vmatpush1.bf16.msra.mxu1 %v2998_v7  ;;  %v3016_v19 = vld [vmem:[%s3833_s9 + $0x40] ss:$8 sps:$4 sm:$0xff]   ;;  %v3018_v21 = vld [vmem:[%s3833_s9 + $0x54] ss:$8 sps:$4 sm:$0xff]   ;;  %v3022_v23 = vld [vmem:[%s3833_s9 + $0x50] ss:$8 sps:$4 sm:$0xff]  }
  0xe1   : > { %1452 = vmatpush1.bf16.msra.mxu0 %v2999_v8  ;;  %1260 = vmatprep.subr.bf16.mxu1 %v3000_v9  ;;  %v3017_v20 = vld [vmem:[%s3833_s9 + $0x140] ss:$8 sps:$4 sm:$0xff]   ;;  %v3020_v22 = vld [vmem:[%s3833_s9 + $0x154] ss:$8 sps:$4 sm:$0xff]   ;;  %v3023_v24 = vld [vmem:[%s3833_s9 + $0x150] ss:$8 sps:$4 sm:$0xff]  }
  0xe2   : > { %1453 = vmatprep.subr.bf16.mxu0 %v3002_v10  ;;  %v3024_v25 = vld [vmem:[%s3833_s9 + $0x64] ss:$8 sps:$4 sm:$0xff]   ;;  %v3028_v27 = vld [vmem:[%s3833_s9 + $0x60] ss:$8 sps:$4 sm:$0xff]   ;;  %v3030_v29 = vld [vmem:[%s3833_s9 + $0x74] ss:$8 sps:$4 sm:$0xff]  }
  0xe3   : > { %v3026_v26 = vld [vmem:[%s3833_s9 + $0x164] ss:$8 sps:$4 sm:$0xff]   ;;  %v3029_v28 = vld [vmem:[%s3833_s9 + $0x160] ss:$8 sps:$4 sm:$0xff]   ;;  %v3032_v30 = vld [vmem:[%s3833_s9 + $0x174] ss:$8 sps:$4 sm:$0xff]  }
  0xe4   : > { %1261 = vmatpush1.bf16.msra.mxu1 %v3004_v11  ;;  %v3034_v31 = vld [vmem:[%s3833_s9 + $0x70] ss:$8 sps:$4 sm:$0xff]   ;;  %v3036_v33 = vld [vmem:[%s3833_s9 + $0x84] ss:$8 sps:$4 sm:$0xff]   ;;  %v3040_v35 = vld [vmem:[%s3833_s9 + $0x80] ss:$8 sps:$4 sm:$0xff]  }
  0xe5   : > { %1454 = vmatpush1.bf16.msra.mxu0 %v3005_v12  ;;  %1262 = vmatprep.subr.bf16.mxu1 %v3006_v13  ;;  %v3035_v32 = vld [vmem:[%s3833_s9 + $0x170] ss:$8 sps:$4 sm:$0xff]   ;;  %v3038_v34 = vld [vmem:[%s3833_s9 + $0x184] ss:$8 sps:$4 sm:$0xff]   ;;  %v3041_v36 = vld [vmem:[%s3833_s9 + $0x180] ss:$8 sps:$4 sm:$0xff]  }
  0xe6   : > { %1455 = vmatprep.subr.bf16.mxu0 %v3008_v14  ;;  %v3042_v37 = vld [vmem:[%s3833_s9 + $0x94] ss:$8 sps:$4 sm:$0xff]   ;;  %v3046_v39 = vld [vmem:[%s3833_s9 + $0x90] ss:$8 sps:$4 sm:$0xff]   ;;  %v3048_v41 = vld [vmem:[%s3833_s9 + $0xa4] ss:$8 sps:$4 sm:$0xff]  }
  0xe7   : > { %v3044_v38 = vld [vmem:[%s3833_s9 + $0x194] ss:$8 sps:$4 sm:$0xff]   ;;  %v3047_v40 = vld [vmem:[%s3833_s9 + $0x190] ss:$8 sps:$4 sm:$0xff]   ;;  %v3050_v42 = vld [vmem:[%s3833_s9 + $0x1a4] ss:$8 sps:$4 sm:$0xff]  }
  0xe8   : > { %1263 = vmatpush1.bf16.msra.mxu1 %v3010_v15  ;;  %v3052_v43 = vld [vmem:[%s3833_s9 + $0xa0] ss:$8 sps:$4 sm:$0xff]   ;;  %v3054_v45 = vld [vmem:[%s3833_s9 + $0xb4] ss:$8 sps:$4 sm:$0xff]   ;;  %v3058_v47 = vld [vmem:[%s3833_s9 + $0xb0] ss:$8 sps:$4 sm:$0xff]  }
  0xe9   : > { %1456 = vmatpush1.bf16.msra.mxu0 %v3011_v16  ;;  %1264 = vmatprep.subr.bf16.mxu1 %v3012_v17  ;;  %v3053_v44 = vld [vmem:[%s3833_s9 + $0x1a0] ss:$8 sps:$4 sm:$0xff]   ;;  %v3056_v46 = vld [vmem:[%s3833_s9 + $0x1b4] ss:$8 sps:$4 sm:$0xff]   ;;  %v3059_v48 = vld [vmem:[%s3833_s9 + $0x1b0] ss:$8 sps:$4 sm:$0xff]  }
  0xea   : > { %1457 = vmatprep.subr.bf16.mxu0 %v3014_v18  ;;  %v3060_v49 = vld [vmem:[%s3833_s9 + $0xc4] ss:$8 sps:$4 sm:$0xff]   ;;  %v3064_v53 = vld [vmem:[%s3833_s9 + $0xc0] ss:$8 sps:$4 sm:$0xff]   ;;  %v3066_v55 = vld [vmem:[%s3833_s9 + $0xd4] ss:$8 sps:$4 sm:$0xff]  }
  0xeb   : > { %v3086_v50 = vld [vmem:[%s3825_s26 + $0x4] ss:$16 sps:$4 sm:$0xff]   ;;  %v3089_v52 = vld [vmem:[%s3825_s26 + $0xc] ss:$16 sps:$4 sm:$0xff]   ;;  %v3065_v54 = vld [vmem:[%s3833_s9 + $0x1c0] ss:$8 sps:$4 sm:$0xff]  }
  0xec   : > { %1265 = vmatpush1.bf16.msra.mxu1 %v3016_v19  ;;  %v3062_v51 = vld [vmem:[%s3833_s9 + $0x1c4] ss:$8 sps:$4 sm:$0xff]   ;;  %1288 = vmatprep.mubr.bf16.mxu1 %v3086_v50  ;;  %v3068_v56 = vld [vmem:[%s3833_s9 + $0x1d4] ss:$8 sps:$4 sm:$0xff]   ;;  %v3070_v57 = vld [vmem:[%s3833_s9 + $0xd0] ss:$8 sps:$4 sm:$0xff]  }
  0xed   : > { %1458 = vmatpush1.bf16.msra.mxu0 %v3017_v20  ;;  %1266 = vmatprep.subr.bf16.mxu1 %v3018_v21  ;;  %v3071_v58 = vld [vmem:[%s3833_s9 + $0x1d0] ss:$8 sps:$4 sm:$0xff]   ;;  %v3072_v59 = vld [vmem:[%s3833_s9 + $0xe4] ss:$8 sps:$4 sm:$0xff]   ;;  %v3076_v61 = vld [vmem:[%s3833_s9 + $0xe0] ss:$8 sps:$4 sm:$0xff]  }
  0xee   : > { %1459 = vmatprep.subr.bf16.mxu0 %v3020_v22  ;;  %1481 = vmatprep.mubr.bf16.mxu0 %v3089_v52  ;;  %v3074_v60 = vld [vmem:[%s3833_s9 + $0x1e4] ss:$8 sps:$4 sm:$0xff]   ;;  %v3077_v62 = vld [vmem:[%s3833_s9 + $0x1e0] ss:$8 sps:$4 sm:$0xff]   ;;  %v3078_v63 = vld [vmem:[%s3833_s9 + $0xf4] ss:$8 sps:$4 sm:$0xff]  }
  0xef   : > { %v3080_v0 = vld [vmem:[%s3833_s9 + $0x1f4] ss:$8 sps:$4 sm:$0xff]   ;;  %v3082_v1 = vld [vmem:[%s3833_s9 + $0xf0] ss:$8 sps:$4 sm:$0xff]   ;;  %s4356_s4 = sld [smem:[#allocation15_spill]] }
  0xf0   : > { %1267 = vmatpush1.bf16.msra.mxu1 %v3022_v23  ;;  %v3083_v2 = vld [vmem:[%s3833_s9 + $0x1f0] ss:$8 sps:$4 sm:$0xff]   ;;  %v3090_v5 = vld [vmem:[%s3825_s26 + $0x24] ss:$16 sps:$4 sm:$0xff]   ;;  %v3092_v6 = vld [vmem:[%s3825_s26 + $0x2c] ss:$16 sps:$4 sm:$0xff]  }
  0xf1   : > { %1460 = vmatpush1.bf16.msra.mxu0 %v3023_v24  ;;  %1268 = vmatprep.subr.bf16.mxu1 %v3024_v25  ;;  %v3084_v3 = vld [vmem:[%s3825_s26] ss:$16 sps:$4 sm:$0xff]   ;;  %v3087_v4 = vld [vmem:[%s3825_s26 + $0x8] ss:$16 sps:$4 sm:$0xff]   ;;  %v3096_v9 = vld [vmem:[%s3825_s26 + $0x44] ss:$16 sps:$4 sm:$0xff]  }
  0xf2   : > { %1461 = vmatprep.subr.bf16.mxu0 %v3026_v26  ;;  %v3094_v7 = vld [vmem:[%s3825_s26 + $0x20] ss:$16 sps:$4 sm:$0xff]   ;;  %v3095_v8 = vld [vmem:[%s3825_s26 + $0x28] ss:$16 sps:$4 sm:$0xff]   ;;  %v3098_v10 = vld [vmem:[%s3825_s26 + $0x4c] ss:$16 sps:$4 sm:$0xff]  }
  0xf3   : > { %v3100_v11 = vld [vmem:[%s3825_s26 + $0x40] ss:$16 sps:$4 sm:$0xff]   ;;  %v3101_v12 = vld [vmem:[%s3825_s26 + $0x48] ss:$16 sps:$4 sm:$0xff]   ;;  %v3102_v13 = vld [vmem:[%s3825_s26 + $0x64] ss:$16 sps:$4 sm:$0xff]  }
  0xf4   : > { %1269 = vmatpush1.bf16.msra.mxu1 %v3028_v27  ;;  %v3104_v14 = vld [vmem:[%s3825_s26 + $0x6c] ss:$16 sps:$4 sm:$0xff]   ;;  %v3106_v15 = vld [vmem:[%s3825_s26 + $0x60] ss:$16 sps:$4 sm:$0xff]   ;;  %v3107_v16 = vld [vmem:[%s3825_s26 + $0x68] ss:$16 sps:$4 sm:$0xff]  }
  0xf5   : > { %1462 = vmatpush1.bf16.msra.mxu0 %v3029_v28  ;;  %1270 = vmatprep.subr.bf16.mxu1 %v3030_v29  ;;  %v3108_v17 = vld [vmem:[%s3825_s26 + $0x84] ss:$16 sps:$4 sm:$0xff]   ;;  %v3110_v18 = vld [vmem:[%s3825_s26 + $0x8c] ss:$16 sps:$4 sm:$0xff]   ;;  %v3112_v19 = vld [vmem:[%s3825_s26 + $0x80] ss:$16 sps:$4 sm:$0xff]  }
  0xf6   : > { %1463 = vmatprep.subr.bf16.mxu0 %v3032_v30  ;;  %v3113_v20 = vld [vmem:[%s3825_s26 + $0x88] ss:$16 sps:$4 sm:$0xff]   ;;  %v3114_v21 = vld [vmem:[%s3825_s26 + $0xa4] ss:$16 sps:$4 sm:$0xff]   ;;  %v3116_v22 = vld [vmem:[%s3825_s26 + $0xac] ss:$16 sps:$4 sm:$0xff]  }
  0xf7   : > { %v3118_v23 = vld [vmem:[%s3825_s26 + $0xa0] ss:$16 sps:$4 sm:$0xff]   ;;  %v3119_v24 = vld [vmem:[%s3825_s26 + $0xa8] ss:$16 sps:$4 sm:$0xff]   ;;  %v3120_v25 = vld [vmem:[%s3825_s26 + $0xc4] ss:$16 sps:$4 sm:$0xff]  }
  0xf8   : > { %1271 = vmatpush1.bf16.msra.mxu1 %v3034_v31  ;;  %v3122_v26 = vld [vmem:[%s3825_s26 + $0xcc] ss:$16 sps:$4 sm:$0xff]   ;;  %v3124_v27 = vld [vmem:[%s3825_s26 + $0xc0] ss:$16 sps:$4 sm:$0xff]   ;;  %v3125_v28 = vld [vmem:[%s3825_s26 + $0xc8] ss:$16 sps:$4 sm:$0xff]  }
  0xf9   : > { %1464 = vmatpush1.bf16.msra.mxu0 %v3035_v32  ;;  %1272 = vmatprep.subr.bf16.mxu1 %v3036_v33  ;;  %v3126_v29 = vld [vmem:[%s3825_s26 + $0xe4] ss:$16 sps:$4 sm:$0xff]   ;;  %v3128_v30 = vld [vmem:[%s3825_s26 + $0xec] ss:$16 sps:$4 sm:$0xff]   ;;  %v3130_v31 = vld [vmem:[%s3825_s26 + $0xe0] ss:$16 sps:$4 sm:$0xff]  }
  0xfa   : > { %1465 = vmatprep.subr.bf16.mxu0 %v3038_v34  ;;  %v3131_v32 = vld [vmem:[%s3825_s26 + $0xe8] ss:$16 sps:$4 sm:$0xff]   ;;  %v3132_v33 = vld [vmem:[%s3825_s26 + $0x104] ss:$16 sps:$4 sm:$0xff]   ;;  %v3134_v34 = vld [vmem:[%s3825_s26 + $0x10c] ss:$16 sps:$4 sm:$0xff]  }
  0xfb   : > { %v3158_v50 = vld [vmem:[%s3825_s26 + $0x18c] ss:$16 sps:$4 sm:$0xff]   ;;  %v3161_v52 = vld [vmem:[%s3825_s26 + $0x188] ss:$16 sps:$4 sm:$0xff]   ;;  %p2687_p6 = scmp.ne.s32.totalorder %s4356_s4, 1 }
  0xfc   : > { %1273 = vmatpush1.bf16.msra.mxu1 %v3040_v35  ;;  %v3136_v35 = vld [vmem:[%s3825_s26 + $0x100] ss:$16 sps:$4 sm:$0xff]  }
  0xfd   : > { %1466 = vmatpush1.bf16.msra.mxu0 %v3041_v36  ;;  %1274 = vmatprep.subr.bf16.mxu1 %v3042_v37  ;;  %v3137_v36 = vld [vmem:[%s3825_s26 + $0x108] ss:$16 sps:$4 sm:$0xff]   ;;  %v3138_v37 = vld [vmem:[%s3825_s26 + $0x124] ss:$16 sps:$4 sm:$0xff]  }
  0xfe   : > { %1467 = vmatprep.subr.bf16.mxu0 %v3044_v38  ;;  %v3140_v38 = vld [vmem:[%s3825_s26 + $0x12c] ss:$16 sps:$4 sm:$0xff]  }
 0x100   : > { %1275 = vmatpush1.bf16.msra.mxu1 %v3046_v39  ;;  %v3142_v39 = vld [vmem:[%s3825_s26 + $0x120] ss:$16 sps:$4 sm:$0xff]  }
 0x101   : > { %1468 = vmatpush1.bf16.msra.mxu0 %v3047_v40  ;;  %1276 = vmatprep.subr.bf16.mxu1 %v3048_v41  ;;  %v3143_v40 = vld [vmem:[%s3825_s26 + $0x128] ss:$16 sps:$4 sm:$0xff]   ;;  %v3144_v41 = vld [vmem:[%s3825_s26 + $0x144] ss:$16 sps:$4 sm:$0xff]  }
 0x102   : > { %1469 = vmatprep.subr.bf16.mxu0 %v3050_v42  ;;  %v3146_v42 = vld [vmem:[%s3825_s26 + $0x14c] ss:$16 sps:$4 sm:$0xff]  }
 0x104   : > { %1277 = vmatpush1.bf16.msra.mxu1 %v3052_v43  ;;  %v3148_v43 = vld [vmem:[%s3825_s26 + $0x140] ss:$16 sps:$4 sm:$0xff]  }
 0x105   : > { %1470 = vmatpush1.bf16.msra.mxu0 %v3053_v44  ;;  %1278 = vmatprep.subr.bf16.mxu1 %v3054_v45  ;;  %v3149_v44 = vld [vmem:[%s3825_s26 + $0x148] ss:$16 sps:$4 sm:$0xff]   ;;  %v3150_v45 = vld [vmem:[%s3825_s26 + $0x164] ss:$16 sps:$4 sm:$0xff]  }
 0x106   : > { %1471 = vmatprep.subr.bf16.mxu0 %v3056_v46  ;;  %v3152_v46 = vld [vmem:[%s3825_s26 + $0x16c] ss:$16 sps:$4 sm:$0xff]  }
 0x108   : > { %1279 = vmatpush1.bf16.msra.mxu1 %v3058_v47  ;;  %v3154_v47 = vld [vmem:[%s3825_s26 + $0x160] ss:$16 sps:$4 sm:$0xff]  }
 0x109   : > { %1472 = vmatpush1.bf16.msra.mxu0 %v3059_v48  ;;  %1280 = vmatprep.subr.bf16.mxu1 %v3060_v49  ;;  %v3155_v48 = vld [vmem:[%s3825_s26 + $0x168] ss:$16 sps:$4 sm:$0xff]   ;;  %v3156_v49 = vld [vmem:[%s3825_s26 + $0x184] ss:$16 sps:$4 sm:$0xff]  }
 0x10a   : > { %1473 = vmatprep.subr.bf16.mxu0 %v3062_v51  ;;  %v3160_v51 = vld [vmem:[%s3825_s26 + $0x180] ss:$16 sps:$4 sm:$0xff]  }
 0x10c   : > { %1281 = vmatpush1.bf16.msra.mxu1 %v3064_v53  ;;  %v3162_v53 = vld [vmem:[%s3825_s26 + $0x1a4] ss:$16 sps:$4 sm:$0xff]  }
 0x10d   : > { %1474 = vmatpush1.bf16.msra.mxu0 %v3065_v54  ;;  %1282 = vmatprep.subr.bf16.mxu1 %v3066_v55  ;;  %v3164_v54 = vld [vmem:[%s3825_s26 + $0x1ac] ss:$16 sps:$4 sm:$0xff]   ;;  %v3166_v55 = vld [vmem:[%s3825_s26 + $0x1a0] ss:$16 sps:$4 sm:$0xff]  }
 0x10e   : > { %1475 = vmatprep.subr.bf16.mxu0 %v3068_v56  ;;  %v3167_v56 = vld [vmem:[%s3825_s26 + $0x1a8] ss:$16 sps:$4 sm:$0xff]  }
 0x110   : > { %1283 = vmatpush1.bf16.msra.mxu1 %v3070_v57  ;;  %v3168_v57 = vld [vmem:[%s3825_s26 + $0x1c4] ss:$16 sps:$4 sm:$0xff]  }
 0x111   : > { %1476 = vmatpush1.bf16.msra.mxu0 %v3071_v58  ;;  %1284 = vmatprep.subr.bf16.mxu1 %v3072_v59  ;;  %v3170_v58 = vld [vmem:[%s3825_s26 + $0x1cc] ss:$16 sps:$4 sm:$0xff]   ;;  %v3172_v59 = vld [vmem:[%s3825_s26 + $0x1c0] ss:$16 sps:$4 sm:$0xff]  }
 0x112   : > { %1477 = vmatprep.subr.bf16.mxu0 %v3074_v60  ;;  %v3173_v60 = vld [vmem:[%s3825_s26 + $0x1c8] ss:$16 sps:$4 sm:$0xff]  }
 0x114   : > { %1285 = vmatpush1.bf16.msra.mxu1 %v3076_v61  ;;  %v3174_v61 = vld [vmem:[%s3825_s26 + $0x1e4] ss:$16 sps:$4 sm:$0xff]  }
 0x115   : > { %1478 = vmatpush1.bf16.msra.mxu0 %v3077_v62  ;;  %1286 = vmatprep.subr.bf16.mxu1 %v3078_v63  ;;  %v3176_v62 = vld [vmem:[%s3825_s26 + $0x1ec] ss:$16 sps:$4 sm:$0xff]   ;;  %v3178_v63 = vld [vmem:[%s3825_s26 + $0x1e0] ss:$16 sps:$4 sm:$0xff]  }
 0x116   : > { %1479 = vmatprep.subr.bf16.mxu0 %v3080_v0  ;;  %v3179_v0 = vld [vmem:[%s3825_s26 + $0x1e8] ss:$16 sps:$4 sm:$0xff]  }
 0x118   : > { %1287 = vmatpush1.bf16.msra.mxu1 %v3082_v1 }
 0x119   : > { %1480 = vmatpush1.bf16.msra.mxu0 %v3083_v2  ;;  %v424_v2 = vld [vmem:[#allocation2] sm:$0xff] }
 0x11b   : > { %1289 = vmatmul.mubr.bf16.vlgmr.msra.gmra.mrb[0].mxu1 %v3084_v3 }
 0x11c   : > { %1482 = vmatmul.mubr.bf16.vlgmr.msra.gmra.mrb[0].mxu0 %v3087_v4  ;;  %1298 = vmatprep.mubr.bf16.mxu1 %v3090_v5 }
 0x11d   : > { %1491 = vmatprep.mubr.bf16.mxu0 %v3092_v6  ;;  %v425_v6 = vld [vmem:[#allocation2 + $0x8] sm:$0xff] }
 0x123   : > { %1299 = vmatmul.mubr.bf16.gmra.mrb[4].mxu1 %v3094_v7 }
 0x124   : > { %1492 = vmatmul.mubr.bf16.gmra.mrb[4].mxu0 %v3095_v8  ;;  %1308 = vmatprep.mubr.bf16.mxu1 %v3096_v9 }
 0x125   : > { %1501 = vmatprep.mubr.bf16.mxu0 %v3098_v10  ;;  %v426_v10 = vld [vmem:[#allocation2 + $0x10] sm:$0xff] }
 0x12b   : > { %1309 = vmatmul.mubr.bf16.gmra.mrb[8].mxu1 %v3100_v11 }
 0x12c   : > { %1502 = vmatmul.mubr.bf16.gmra.mrb[8].mxu0 %v3101_v12  ;;  %1318 = vmatprep.mubr.bf16.mxu1 %v3102_v13 }
 0x12d   : > { %1511 = vmatprep.mubr.bf16.mxu0 %v3104_v14 }
 0x133   : > { %1319 = vmatmul.mubr.bf16.gmra.mrb[12].mxu1 %v3106_v15  ;;  %v427_v15 = vld [vmem:[#allocation2 + $0x18] sm:$0xff] }
 0x134   : > { %1512 = vmatmul.mubr.bf16.gmra.mrb[12].mxu0 %v3107_v16  ;;  %1328 = vmatprep.mubr.bf16.mxu1 %v3108_v17 }
 0x135   : > { %1521 = vmatprep.mubr.bf16.mxu0 %v3110_v18 }
 0x13b   : > { %1329 = vmatmul.mubr.bf16.gmra.mrb[16].mxu1 %v3112_v19 }
 0x13c   : > { %1522 = vmatmul.mubr.bf16.gmra.mrb[16].mxu0 %v3113_v20  ;;  %1338 = vmatprep.mubr.bf16.mxu1 %v3114_v21 }
 0x13d   : > { %1531 = vmatprep.mubr.bf16.mxu0 %v3116_v22  ;;  %v428_v22 = vld [vmem:[#allocation2 + $0x20] sm:$0xff] }
 0x143   : > { %1339 = vmatmul.mubr.bf16.gmra.mrb[20].mxu1 %v3118_v23 }
 0x144   : > { %1532 = vmatmul.mubr.bf16.gmra.mrb[20].mxu0 %v3119_v24  ;;  %1348 = vmatprep.mubr.bf16.mxu1 %v3120_v25 }
 0x145   : > { %1541 = vmatprep.mubr.bf16.mxu0 %v3122_v26  ;;  %v429_v26 = vld [vmem:[#allocation2 + $0x28] sm:$0xff] }
 0x14b   : > { %1349 = vmatmul.mubr.bf16.gmra.mrb[24].mxu1 %v3124_v27 }
 0x14c   : > { %1542 = vmatmul.mubr.bf16.gmra.mrb[24].mxu0 %v3125_v28  ;;  %1358 = vmatprep.mubr.bf16.mxu1 %v3126_v29 }
 0x14d   : > { %1551 = vmatprep.mubr.bf16.mxu0 %v3128_v30  ;;  %v430_v30 = vld [vmem:[#allocation2 + $0x30] sm:$0xff] }
 0x153   : > { %1359 = vmatmul.mubr.bf16.gmra.mrb[28].mxu1 %v3130_v31 }
 0x154   : > { %1552 = vmatmul.mubr.bf16.gmra.mrb[28].mxu0 %v3131_v32  ;;  %1368 = vmatprep.mubr.bf16.mxu1 %v3132_v33 }
 0x155   : > { %1561 = vmatprep.mubr.bf16.mxu0 %v3134_v34 }
 0x15b   : > { %1369 = vmatmul.mubr.bf16.gmra.mrb[32].mxu1 %v3136_v35  ;;  %v431_v35 = vld [vmem:[#allocation2 + $0x38] sm:$0xff] }
 0x15c   : > { %1562 = vmatmul.mubr.bf16.gmra.mrb[32].mxu0 %v3137_v36  ;;  %1378 = vmatprep.mubr.bf16.mxu1 %v3138_v37 }
 0x15d   : > { %1571 = vmatprep.mubr.bf16.mxu0 %v3140_v38 }
 0x163   : > { %1379 = vmatmul.mubr.bf16.gmra.mrb[36].mxu1 %v3142_v39 }
 0x164   : > { %1572 = vmatmul.mubr.bf16.gmra.mrb[36].mxu0 %v3143_v40  ;;  %1388 = vmatprep.mubr.bf16.mxu1 %v3144_v41 }
 0x165   : > { %1581 = vmatprep.mubr.bf16.mxu0 %v3146_v42  ;;  %v432_v42 = vld [vmem:[#allocation2 + $0x40] sm:$0xff] }
 0x16b   : > { %1389 = vmatmul.mubr.bf16.gmra.mrb[40].mxu1 %v3148_v43 }
 0x16c   : > { %1582 = vmatmul.mubr.bf16.gmra.mrb[40].mxu0 %v3149_v44  ;;  %1398 = vmatprep.mubr.bf16.mxu1 %v3150_v45 }
 0x16d   : > { %1591 = vmatprep.mubr.bf16.mxu0 %v3152_v46  ;;  %v433_v46 = vld [vmem:[#allocation2 + $0x48] sm:$0xff] }
 0x173   : > { %1399 = vmatmul.mubr.bf16.gmra.mrb[44].mxu1 %v3154_v47 }
 0x174   : > { %1592 = vmatmul.mubr.bf16.gmra.mrb[44].mxu0 %v3155_v48  ;;  %1408 = vmatprep.mubr.bf16.mxu1 %v3156_v49 }
 0x175   : > { %1601 = vmatprep.mubr.bf16.mxu0 %v3158_v50  ;;  %v434_v50 = vld [vmem:[#allocation2 + $0x50] sm:$0xff] }
 0x17b   : > { %1409 = vmatmul.mubr.bf16.gmra.mrb[48].mxu1 %v3160_v51 }
 0x17c   : > { %1602 = vmatmul.mubr.bf16.gmra.mrb[48].mxu0 %v3161_v52  ;;  %1418 = vmatprep.mubr.bf16.mxu1 %v3162_v53 }
 0x17d   : > { %1611 = vmatprep.mubr.bf16.mxu0 %v3164_v54 }
 0x183   : > { %1419 = vmatmul.mubr.bf16.gmra.mrb[52].mxu1 %v3166_v55  ;;  %v435_v55 = vld [vmem:[#allocation2 + $0x58] sm:$0xff] }
 0x184   : > { %1612 = vmatmul.mubr.bf16.gmra.mrb[52].mxu0 %v3167_v56  ;;  %1428 = vmatprep.mubr.bf16.mxu1 %v3168_v57 }
 0x185   : > { %1621 = vmatprep.mubr.bf16.mxu0 %v3170_v58 }
 0x18b   : > { %1429 = vmatmul.mubr.bf16.gmra.mrb[56].mxu1 %v3172_v59 }
 0x18c   : > { %1622 = vmatmul.mubr.bf16.gmra.mrb[56].mxu0 %v3173_v60  ;;  %1438 = vmatprep.mubr.bf16.mxu1 %v3174_v61 }
 0x18d   : > { %1631 = vmatprep.mubr.bf16.mxu0 %v3176_v62  ;;  %v436_v62 = vld [vmem:[#allocation2 + $0x60] sm:$0xff] }
 0x193   : > { %1439 = vmatmul.mubr.bf16.gmra.mrb[60].mxu1 %v3178_v63 }
 0x194   : > { %1632 = vmatmul.mubr.bf16.gmra.mrb[60].mxu0 %v3179_v0 }
 0x1ee   : > { %v1290_v1 = vpop.f32.mrb[0].mxu1 }
 0x1ef   : > { %v1483_v3 = vpop.f32.mrb[0].mxu0  ;;  %v1292_v5 = vpop.f32.mrb[1].mxu1 }
 0x1f0   : > { %v1484_v4 = vadd.f32 %v1483_v3, %v1290_v1  ;;  %v1485_v7 = vpop.f32.mrb[1].mxu0  ;;  %v1294_v9 = vpop.f32.mrb[2].mxu1 }
 0x1f1   : > { %v1486_v8 = vadd.f32 %v1485_v7, %v1292_v5  ;;  %v1487_v11 = vpop.f32.mrb[2].mxu0  ;;  %v1296_v14 = vpop.f32.mrb[3].mxu1 }
 0x1f2   : > { %v1642_v12 = vadd.f32 %v1484_v4, %v424_v2  ;;  %v1488_v13 = vadd.f32 %v1487_v11, %v1294_v9  ;;  %v1489_v16 = vpop.f32.mrb[3].mxu0  ;;  %v437_v2 = vld [vmem:[#allocation2 + $0x68] sm:$0xff]  ;;  %v439_v11 = vld [vmem:[#allocation2 + $0x78] sm:$0xff] }
 0x1f3   : > { %v1643_v17 = vadd.f32 %v1486_v8, %v425_v6  ;;  %v1490_v18 = vadd.f32 %v1489_v16, %v1296_v14  ;;  %v438_v6 = vld [vmem:[#allocation2 + $0x70] sm:$0xff] }
 0x1f4   : > { %1706 = vst [vmem:[#allocation2] sm:$0xff] %v1642_v12  ;;  %v1644_v19 = vadd.f32 %v1488_v13, %v426_v10 }
 0x1f5   : > { %1707 = vst [vmem:[#allocation2 + $0x8] sm:$0xff] %v1643_v17  ;;  %v1645_v20 = vadd.f32 %v1490_v18, %v427_v15  ;;  %v440_v18 = vld [vmem:[#allocation2 + $0x80] sm:$0xff] }
 0x1f6   : > { %1708 = vst [vmem:[#allocation2 + $0x10] sm:$0xff] %v1644_v19  ;;  %v1300_v21 = vpop.f32.mrb[4].mxu1 }
 0x1f7   : > { %1709 = vst [vmem:[#allocation2 + $0x18] sm:$0xff] %v1645_v20  ;;  %v1493_v23 = vpop.f32.mrb[4].mxu0  ;;  %v1302_v25 = vpop.f32.mrb[5].mxu1 }
 0x1f8   : > { %v1494_v24 = vadd.f32 %v1493_v23, %v1300_v21  ;;  %v1495_v27 = vpop.f32.mrb[5].mxu0  ;;  %v1304_v29 = vpop.f32.mrb[6].mxu1 }
 0x1f9   : > { %v1496_v28 = vadd.f32 %v1495_v27, %v1302_v25  ;;  %v1497_v31 = vpop.f32.mrb[6].mxu0  ;;  %v1306_v34 = vpop.f32.mrb[7].mxu1 }
 0x1fa   : > { %v1646_v32 = vadd.f32 %v1494_v24, %v428_v22  ;;  %v1498_v33 = vadd.f32 %v1497_v31, %v1304_v29  ;;  %v1499_v36 = vpop.f32.mrb[7].mxu0  ;;  %v441_v22 = vld [vmem:[#allocation2 + $0x88] sm:$0xff]  ;;  %v443_v31 = vld [vmem:[#allocation2 + $0x98] sm:$0xff] }
 0x1fb   : > { %v1647_v37 = vadd.f32 %v1496_v28, %v429_v26  ;;  %v1500_v38 = vadd.f32 %v1499_v36, %v1306_v34  ;;  %v442_v26 = vld [vmem:[#allocation2 + $0x90] sm:$0xff] }
 0x1fc   : > { %1710 = vst [vmem:[#allocation2 + $0x20] sm:$0xff] %v1646_v32  ;;  %v1648_v39 = vadd.f32 %v1498_v33, %v430_v30 }
 0x1fd   : > { %1711 = vst [vmem:[#allocation2 + $0x28] sm:$0xff] %v1647_v37  ;;  %v1649_v40 = vadd.f32 %v1500_v38, %v431_v35  ;;  %v444_v38 = vld [vmem:[#allocation2 + $0xa0] sm:$0xff] }
 0x1fe   : > { %1712 = vst [vmem:[#allocation2 + $0x30] sm:$0xff] %v1648_v39  ;;  %v1310_v41 = vpop.f32.mrb[8].mxu1 }
 0x1ff   : > { %1713 = vst [vmem:[#allocation2 + $0x38] sm:$0xff] %v1649_v40  ;;  %v1503_v43 = vpop.f32.mrb[8].mxu0  ;;  %v1312_v45 = vpop.f32.mrb[9].mxu1 }
 0x200   : > { %v1504_v44 = vadd.f32 %v1503_v43, %v1310_v41  ;;  %v1505_v47 = vpop.f32.mrb[9].mxu0  ;;  %v1314_v49 = vpop.f32.mrb[10].mxu1 }
 0x201   : > { %v1506_v48 = vadd.f32 %v1505_v47, %v1312_v45  ;;  %v1507_v51 = vpop.f32.mrb[10].mxu0  ;;  %v1316_v54 = vpop.f32.mrb[11].mxu1 }
 0x202   : > { %v1650_v52 = vadd.f32 %v1504_v44, %v432_v42  ;;  %v1508_v53 = vadd.f32 %v1507_v51, %v1314_v49  ;;  %v1509_v56 = vpop.f32.mrb[11].mxu0  ;;  %v445_v42 = vld [vmem:[#allocation2 + $0xa8] sm:$0xff]  ;;  %v447_v51 = vld [vmem:[#allocation2 + $0xb8] sm:$0xff] }
 0x203   : > { %v1651_v57 = vadd.f32 %v1506_v48, %v433_v46  ;;  %v1510_v58 = vadd.f32 %v1509_v56, %v1316_v54  ;;  %v446_v46 = vld [vmem:[#allocation2 + $0xb0] sm:$0xff] }
 0x204   : > { %1714 = vst [vmem:[#allocation2 + $0x40] sm:$0xff] %v1650_v52  ;;  %v1652_v59 = vadd.f32 %v1508_v53, %v434_v50 }
 0x205   : > { %1715 = vst [vmem:[#allocation2 + $0x48] sm:$0xff] %v1651_v57  ;;  %v1653_v60 = vadd.f32 %v1510_v58, %v435_v55  ;;  %v448_v58 = vld [vmem:[#allocation2 + $0xc0] sm:$0xff] }
 0x206   : > { %1716 = vst [vmem:[#allocation2 + $0x50] sm:$0xff] %v1652_v59  ;;  %v1320_v61 = vpop.f32.mrb[12].mxu1 }
 0x207   : > { %1717 = vst [vmem:[#allocation2 + $0x58] sm:$0xff] %v1653_v60  ;;  %v1513_v63 = vpop.f32.mrb[12].mxu0  ;;  %v1322_v1 = vpop.f32.mrb[13].mxu1 }
 0x208   : > { %v1514_v0 = vadd.f32 %v1513_v63, %v1320_v61  ;;  %v1515_v3 = vpop.f32.mrb[13].mxu0  ;;  %v1324_v5 = vpop.f32.mrb[14].mxu1 }
 0x209   : > { %v1516_v4 = vadd.f32 %v1515_v3, %v1322_v1  ;;  %v1517_v7 = vpop.f32.mrb[14].mxu0  ;;  %v1326_v10 = vpop.f32.mrb[15].mxu1 }
 0x20a   : > { %v1654_v8 = vadd.f32 %v1514_v0, %v436_v62  ;;  %v1518_v9 = vadd.f32 %v1517_v7, %v1324_v5  ;;  %v1519_v12 = vpop.f32.mrb[15].mxu0  ;;  %v449_v62 = vld [vmem:[#allocation2 + $0xc8] sm:$0xff]  ;;  %v451_v7 = vld [vmem:[#allocation2 + $0xd8] sm:$0xff] }
 0x20b   : > { %v1655_v13 = vadd.f32 %v1516_v4, %v437_v2  ;;  %v1520_v14 = vadd.f32 %v1519_v12, %v1326_v10  ;;  %v450_v2 = vld [vmem:[#allocation2 + $0xd0] sm:$0xff] }
 0x20c   : > { %1718 = vst [vmem:[#allocation2 + $0x60] sm:$0xff] %v1654_v8  ;;  %v1656_v15 = vadd.f32 %v1518_v9, %v438_v6 }
 0x20d   : > { %1719 = vst [vmem:[#allocation2 + $0x68] sm:$0xff] %v1655_v13  ;;  %v1657_v16 = vadd.f32 %v1520_v14, %v439_v11  ;;  %v452_v14 = vld [vmem:[#allocation2 + $0xe0] sm:$0xff] }
 0x20e   : > { %1720 = vst [vmem:[#allocation2 + $0x70] sm:$0xff] %v1656_v15  ;;  %v1330_v17 = vpop.f32.mrb[16].mxu1 }
 0x20f   : > { %1721 = vst [vmem:[#allocation2 + $0x78] sm:$0xff] %v1657_v16  ;;  %v1523_v19 = vpop.f32.mrb[16].mxu0  ;;  %v1332_v21 = vpop.f32.mrb[17].mxu1 }
 0x210   : > { %v1524_v20 = vadd.f32 %v1523_v19, %v1330_v17  ;;  %v1525_v23 = vpop.f32.mrb[17].mxu0  ;;  %v1334_v25 = vpop.f32.mrb[18].mxu1 }
 0x211   : > { %v1526_v24 = vadd.f32 %v1525_v23, %v1332_v21  ;;  %v1527_v27 = vpop.f32.mrb[18].mxu0  ;;  %v1336_v30 = vpop.f32.mrb[19].mxu1 }
 0x212   : > { %v1658_v28 = vadd.f32 %v1524_v20, %v440_v18  ;;  %v1528_v29 = vadd.f32 %v1527_v27, %v1334_v25  ;;  %v1529_v32 = vpop.f32.mrb[19].mxu0  ;;  %v453_v18 = vld [vmem:[#allocation2 + $0xe8] sm:$0xff]  ;;  %v455_v27 = vld [vmem:[#allocation2 + $0xf8] sm:$0xff] }
 0x213   : > { %v1659_v33 = vadd.f32 %v1526_v24, %v441_v22  ;;  %v1530_v34 = vadd.f32 %v1529_v32, %v1336_v30  ;;  %v454_v22 = vld [vmem:[#allocation2 + $0xf0] sm:$0xff] }
 0x214   : > { %1722 = vst [vmem:[#allocation2 + $0x80] sm:$0xff] %v1658_v28  ;;  %v1660_v35 = vadd.f32 %v1528_v29, %v442_v26 }
 0x215   : > { %1723 = vst [vmem:[#allocation2 + $0x88] sm:$0xff] %v1659_v33  ;;  %v1661_v36 = vadd.f32 %v1530_v34, %v443_v31  ;;  %v456_v34 = vld [vmem:[#allocation2 + $0x100] sm:$0xff] }
 0x216   : > { %1724 = vst [vmem:[#allocation2 + $0x90] sm:$0xff] %v1660_v35  ;;  %v1340_v37 = vpop.f32.mrb[20].mxu1 }
 0x217   : > { %1725 = vst [vmem:[#allocation2 + $0x98] sm:$0xff] %v1661_v36  ;;  %v1533_v39 = vpop.f32.mrb[20].mxu0  ;;  %v1342_v41 = vpop.f32.mrb[21].mxu1 }
 0x218   : > { %v1534_v40 = vadd.f32 %v1533_v39, %v1340_v37  ;;  %v1535_v43 = vpop.f32.mrb[21].mxu0  ;;  %v1344_v45 = vpop.f32.mrb[22].mxu1 }
 0x219   : > { %v1536_v44 = vadd.f32 %v1535_v43, %v1342_v41  ;;  %v1537_v47 = vpop.f32.mrb[22].mxu0  ;;  %v1346_v50 = vpop.f32.mrb[23].mxu1 }
 0x21a   : > { %v1662_v48 = vadd.f32 %v1534_v40, %v444_v38  ;;  %v1538_v49 = vadd.f32 %v1537_v47, %v1344_v45  ;;  %v1539_v52 = vpop.f32.mrb[23].mxu0  ;;  %v457_v38 = vld [vmem:[#allocation2 + $0x108] sm:$0xff]  ;;  %v459_v47 = vld [vmem:[#allocation2 + $0x118] sm:$0xff] }
 0x21b   : > { %v1663_v53 = vadd.f32 %v1536_v44, %v445_v42  ;;  %v1540_v54 = vadd.f32 %v1539_v52, %v1346_v50  ;;  %v458_v42 = vld [vmem:[#allocation2 + $0x110] sm:$0xff] }
 0x21c   : > { %1726 = vst [vmem:[#allocation2 + $0xa0] sm:$0xff] %v1662_v48  ;;  %v1664_v55 = vadd.f32 %v1538_v49, %v446_v46 }
 0x21d   : > { %1727 = vst [vmem:[#allocation2 + $0xa8] sm:$0xff] %v1663_v53  ;;  %v1665_v56 = vadd.f32 %v1540_v54, %v447_v51  ;;  %v460_v54 = vld [vmem:[#allocation2 + $0x120] sm:$0xff] }
 0x21e   : > { %1728 = vst [vmem:[#allocation2 + $0xb0] sm:$0xff] %v1664_v55  ;;  %v1350_v57 = vpop.f32.mrb[24].mxu1 }
 0x21f   : > { %1729 = vst [vmem:[#allocation2 + $0xb8] sm:$0xff] %v1665_v56  ;;  %v1543_v59 = vpop.f32.mrb[24].mxu0  ;;  %v1352_v61 = vpop.f32.mrb[25].mxu1 }
 0x220   : > { %v1544_v60 = vadd.f32 %v1543_v59, %v1350_v57  ;;  %v1545_v63 = vpop.f32.mrb[25].mxu0  ;;  %v1354_v1 = vpop.f32.mrb[26].mxu1 }
 0x221   : > { %v1546_v0 = vadd.f32 %v1545_v63, %v1352_v61  ;;  %v1547_v3 = vpop.f32.mrb[26].mxu0  ;;  %v1356_v6 = vpop.f32.mrb[27].mxu1 }
 0x222   : > { %v1666_v4 = vadd.f32 %v1544_v60, %v448_v58  ;;  %v1548_v5 = vadd.f32 %v1547_v3, %v1354_v1  ;;  %v1549_v8 = vpop.f32.mrb[27].mxu0  ;;  %v461_v58 = vld [vmem:[#allocation2 + $0x128] sm:$0xff]  ;;  %v463_v3 = vld [vmem:[#allocation2 + $0x138] sm:$0xff] }
 0x223   : > { %v1667_v9 = vadd.f32 %v1546_v0, %v449_v62  ;;  %v1550_v10 = vadd.f32 %v1549_v8, %v1356_v6  ;;  %v462_v62 = vld [vmem:[#allocation2 + $0x130] sm:$0xff] }
 0x224   : > { %1730 = vst [vmem:[#allocation2 + $0xc0] sm:$0xff] %v1666_v4  ;;  %v1668_v11 = vadd.f32 %v1548_v5, %v450_v2 }
 0x225   : > { %1731 = vst [vmem:[#allocation2 + $0xc8] sm:$0xff] %v1667_v9  ;;  %v1669_v12 = vadd.f32 %v1550_v10, %v451_v7  ;;  %v464_v10 = vld [vmem:[#allocation2 + $0x140] sm:$0xff] }
 0x226   : > { %1732 = vst [vmem:[#allocation2 + $0xd0] sm:$0xff] %v1668_v11  ;;  %v1360_v13 = vpop.f32.mrb[28].mxu1 }
 0x227   : > { %1733 = vst [vmem:[#allocation2 + $0xd8] sm:$0xff] %v1669_v12  ;;  %v1553_v15 = vpop.f32.mrb[28].mxu0  ;;  %v1362_v17 = vpop.f32.mrb[29].mxu1 }
 0x228   : > { %v1554_v16 = vadd.f32 %v1553_v15, %v1360_v13  ;;  %v1555_v19 = vpop.f32.mrb[29].mxu0  ;;  %v1364_v21 = vpop.f32.mrb[30].mxu1 }
 0x229   : > { %v1556_v20 = vadd.f32 %v1555_v19, %v1362_v17  ;;  %v1557_v23 = vpop.f32.mrb[30].mxu0  ;;  %v1366_v26 = vpop.f32.mrb[31].mxu1 }
 0x22a   : > { %v1670_v24 = vadd.f32 %v1554_v16, %v452_v14  ;;  %v1558_v25 = vadd.f32 %v1557_v23, %v1364_v21  ;;  %v1559_v28 = vpop.f32.mrb[31].mxu0  ;;  %v465_v14 = vld [vmem:[#allocation2 + $0x148] sm:$0xff]  ;;  %v467_v23 = vld [vmem:[#allocation2 + $0x158] sm:$0xff] }
 0x22b   : > { %v1671_v29 = vadd.f32 %v1556_v20, %v453_v18  ;;  %v1560_v30 = vadd.f32 %v1559_v28, %v1366_v26  ;;  %v466_v18 = vld [vmem:[#allocation2 + $0x150] sm:$0xff] }
 0x22c   : > { %1734 = vst [vmem:[#allocation2 + $0xe0] sm:$0xff] %v1670_v24  ;;  %v1672_v31 = vadd.f32 %v1558_v25, %v454_v22 }
 0x22d   : > { %1735 = vst [vmem:[#allocation2 + $0xe8] sm:$0xff] %v1671_v29  ;;  %v1673_v32 = vadd.f32 %v1560_v30, %v455_v27  ;;  %v468_v30 = vld [vmem:[#allocation2 + $0x160] sm:$0xff] }
 0x22e   : > { %1736 = vst [vmem:[#allocation2 + $0xf0] sm:$0xff] %v1672_v31  ;;  %v1370_v33 = vpop.f32.mrb[32].mxu1 }
 0x22f   : > { %1737 = vst [vmem:[#allocation2 + $0xf8] sm:$0xff] %v1673_v32  ;;  %v1563_v35 = vpop.f32.mrb[32].mxu0  ;;  %v1372_v37 = vpop.f32.mrb[33].mxu1 }
 0x230   : > { %v1564_v36 = vadd.f32 %v1563_v35, %v1370_v33  ;;  %v1565_v39 = vpop.f32.mrb[33].mxu0  ;;  %v1374_v41 = vpop.f32.mrb[34].mxu1 }
 0x231   : > { %v1566_v40 = vadd.f32 %v1565_v39, %v1372_v37  ;;  %v1567_v43 = vpop.f32.mrb[34].mxu0  ;;  %v1376_v46 = vpop.f32.mrb[35].mxu1 }
 0x232   : > { %v1674_v44 = vadd.f32 %v1564_v36, %v456_v34  ;;  %v1568_v45 = vadd.f32 %v1567_v43, %v1374_v41  ;;  %v1569_v48 = vpop.f32.mrb[35].mxu0  ;;  %v469_v34 = vld [vmem:[#allocation2 + $0x168] sm:$0xff]  ;;  %v471_v43 = vld [vmem:[#allocation2 + $0x178] sm:$0xff] }
 0x233   : > { %v1675_v49 = vadd.f32 %v1566_v40, %v457_v38  ;;  %v1570_v50 = vadd.f32 %v1569_v48, %v1376_v46  ;;  %v470_v38 = vld [vmem:[#allocation2 + $0x170] sm:$0xff] }
 0x234   : > { %1738 = vst [vmem:[#allocation2 + $0x100] sm:$0xff] %v1674_v44  ;;  %v1676_v51 = vadd.f32 %v1568_v45, %v458_v42 }
 0x235   : > { %1739 = vst [vmem:[#allocation2 + $0x108] sm:$0xff] %v1675_v49  ;;  %v1677_v52 = vadd.f32 %v1570_v50, %v459_v47  ;;  %v472_v50 = vld [vmem:[#allocation2 + $0x180] sm:$0xff] }
 0x236   : > { %1740 = vst [vmem:[#allocation2 + $0x110] sm:$0xff] %v1676_v51  ;;  %v1380_v53 = vpop.f32.mrb[36].mxu1 }
 0x237   : > { %1741 = vst [vmem:[#allocation2 + $0x118] sm:$0xff] %v1677_v52  ;;  %v1573_v55 = vpop.f32.mrb[36].mxu0  ;;  %v1382_v57 = vpop.f32.mrb[37].mxu1 }
 0x238   : > { %v1574_v56 = vadd.f32 %v1573_v55, %v1380_v53  ;;  %v1575_v59 = vpop.f32.mrb[37].mxu0  ;;  %v1384_v61 = vpop.f32.mrb[38].mxu1 }
 0x239   : > { %v1576_v60 = vadd.f32 %v1575_v59, %v1382_v57  ;;  %v1577_v63 = vpop.f32.mrb[38].mxu0  ;;  %v1386_v2 = vpop.f32.mrb[39].mxu1 }
 0x23a   : > { %v1678_v0 = vadd.f32 %v1574_v56, %v460_v54  ;;  %v1578_v1 = vadd.f32 %v1577_v63, %v1384_v61  ;;  %v1579_v4 = vpop.f32.mrb[39].mxu0  ;;  %v473_v54 = vld [vmem:[#allocation2 + $0x188] sm:$0xff]  ;;  %v475_v63 = vld [vmem:[#allocation2 + $0x198] sm:$0xff] }
 0x23b   : > { %v1679_v5 = vadd.f32 %v1576_v60, %v461_v58  ;;  %v1580_v6 = vadd.f32 %v1579_v4, %v1386_v2  ;;  %v474_v58 = vld [vmem:[#allocation2 + $0x190] sm:$0xff] }
 0x23c   : > { %1742 = vst [vmem:[#allocation2 + $0x120] sm:$0xff] %v1678_v0  ;;  %v1680_v7 = vadd.f32 %v1578_v1, %v462_v62 }
 0x23d   : > { %1743 = vst [vmem:[#allocation2 + $0x128] sm:$0xff] %v1679_v5  ;;  %v1681_v8 = vadd.f32 %v1580_v6, %v463_v3  ;;  %v476_v6 = vld [vmem:[#allocation2 + $0x1a0] sm:$0xff] }
 0x23e   : > { %1744 = vst [vmem:[#allocation2 + $0x130] sm:$0xff] %v1680_v7  ;;  %v1390_v9 = vpop.f32.mrb[40].mxu1 }
 0x23f   : > { %1745 = vst [vmem:[#allocation2 + $0x138] sm:$0xff] %v1681_v8  ;;  %v1583_v11 = vpop.f32.mrb[40].mxu0  ;;  %v1392_v13 = vpop.f32.mrb[41].mxu1 }
 0x240   : > { %v1584_v12 = vadd.f32 %v1583_v11, %v1390_v9  ;;  %v1585_v15 = vpop.f32.mrb[41].mxu0  ;;  %v1394_v17 = vpop.f32.mrb[42].mxu1 }
 0x241   : > { %v1586_v16 = vadd.f32 %v1585_v15, %v1392_v13  ;;  %v1587_v19 = vpop.f32.mrb[42].mxu0  ;;  %v1396_v22 = vpop.f32.mrb[43].mxu1 }
 0x242   : > { %v1682_v20 = vadd.f32 %v1584_v12, %v464_v10  ;;  %v1588_v21 = vadd.f32 %v1587_v19, %v1394_v17  ;;  %v1589_v24 = vpop.f32.mrb[43].mxu0  ;;  %v477_v10 = vld [vmem:[#allocation2 + $0x1a8] sm:$0xff]  ;;  %v479_v19 = vld [vmem:[#allocation2 + $0x1b8] sm:$0xff] }
 0x243   : > { %v1683_v25 = vadd.f32 %v1586_v16, %v465_v14  ;;  %v1590_v26 = vadd.f32 %v1589_v24, %v1396_v22  ;;  %v478_v14 = vld [vmem:[#allocation2 + $0x1b0] sm:$0xff] }
 0x244   : > { %1746 = vst [vmem:[#allocation2 + $0x140] sm:$0xff] %v1682_v20  ;;  %v1684_v27 = vadd.f32 %v1588_v21, %v466_v18 }
 0x245   : > { %1747 = vst [vmem:[#allocation2 + $0x148] sm:$0xff] %v1683_v25  ;;  %v1685_v28 = vadd.f32 %v1590_v26, %v467_v23  ;;  %v480_v26 = vld [vmem:[#allocation2 + $0x1c0] sm:$0xff] }
 0x246   : > { %1748 = vst [vmem:[#allocation2 + $0x150] sm:$0xff] %v1684_v27  ;;  %v1400_v29 = vpop.f32.mrb[44].mxu1 }
 0x247   : > { %1749 = vst [vmem:[#allocation2 + $0x158] sm:$0xff] %v1685_v28  ;;  %v1593_v31 = vpop.f32.mrb[44].mxu0  ;;  %v1402_v33 = vpop.f32.mrb[45].mxu1 }
 0x248   : > { %v1594_v32 = vadd.f32 %v1593_v31, %v1400_v29  ;;  %v1595_v35 = vpop.f32.mrb[45].mxu0  ;;  %v1404_v37 = vpop.f32.mrb[46].mxu1 }
 0x249   : > { %v1596_v36 = vadd.f32 %v1595_v35, %v1402_v33  ;;  %v1597_v39 = vpop.f32.mrb[46].mxu0  ;;  %v1406_v42 = vpop.f32.mrb[47].mxu1 }
 0x24a   : > { %v1686_v40 = vadd.f32 %v1594_v32, %v468_v30  ;;  %v1598_v41 = vadd.f32 %v1597_v39, %v1404_v37  ;;  %v1599_v44 = vpop.f32.mrb[47].mxu0  ;;  %v481_v30 = vld [vmem:[#allocation2 + $0x1c8] sm:$0xff]  ;;  %v483_v39 = vld [vmem:[#allocation2 + $0x1d8] sm:$0xff] }
 0x24b   : > { %v1687_v45 = vadd.f32 %v1596_v36, %v469_v34  ;;  %v1600_v46 = vadd.f32 %v1599_v44, %v1406_v42  ;;  %v482_v34 = vld [vmem:[#allocation2 + $0x1d0] sm:$0xff] }
 0x24c   : > { %1750 = vst [vmem:[#allocation2 + $0x160] sm:$0xff] %v1686_v40  ;;  %v1688_v47 = vadd.f32 %v1598_v41, %v470_v38 }
 0x24d   : > { %1751 = vst [vmem:[#allocation2 + $0x168] sm:$0xff] %v1687_v45  ;;  %v1689_v48 = vadd.f32 %v1600_v46, %v471_v43  ;;  %v484_v46 = vld [vmem:[#allocation2 + $0x1e0] sm:$0xff] }
 0x24e   : > { %1752 = vst [vmem:[#allocation2 + $0x170] sm:$0xff] %v1688_v47  ;;  %v1410_v49 = vpop.f32.mrb[48].mxu1 }
 0x24f   : > { %1753 = vst [vmem:[#allocation2 + $0x178] sm:$0xff] %v1689_v48  ;;  %v1603_v51 = vpop.f32.mrb[48].mxu0  ;;  %v1412_v53 = vpop.f32.mrb[49].mxu1 }
 0x250   : > { %v1604_v52 = vadd.f32 %v1603_v51, %v1410_v49  ;;  %v1605_v55 = vpop.f32.mrb[49].mxu0  ;;  %v1414_v57 = vpop.f32.mrb[50].mxu1 }
 0x251   : > { %v1606_v56 = vadd.f32 %v1605_v55, %v1412_v53  ;;  %v1607_v59 = vpop.f32.mrb[50].mxu0  ;;  %v1416_v62 = vpop.f32.mrb[51].mxu1 }
 0x252   : > { %v1690_v60 = vadd.f32 %v1604_v52, %v472_v50  ;;  %v1608_v61 = vadd.f32 %v1607_v59, %v1414_v57  ;;  %v1609_v0 = vpop.f32.mrb[51].mxu0  ;;  %v485_v50 = vld [vmem:[#allocation2 + $0x1e8] sm:$0xff]  ;;  %v487_v59 = vld [vmem:[#allocation2 + $0x1f8] sm:$0xff] }
 0x253   : > { %v1691_v1 = vadd.f32 %v1606_v56, %v473_v54  ;;  %v1610_v2 = vadd.f32 %v1609_v0, %v1416_v62  ;;  %v486_v54 = vld [vmem:[#allocation2 + $0x1f0] sm:$0xff] }
 0x254   : > { %1754 = vst [vmem:[#allocation2 + $0x180] sm:$0xff] %v1690_v60  ;;  %v1692_v3 = vadd.f32 %v1608_v61, %v474_v58 }
 0x255   : > { %1755 = vst [vmem:[#allocation2 + $0x188] sm:$0xff] %v1691_v1  ;;  %v1693_v4 = vadd.f32 %v1610_v2, %v475_v63  ;;  %v1840_v1 = vlaneseq (!%p2687_p6)  ;;  %v1914_v2 = vld [vmem:[%s3842_s24] sm:$0xff] (!%p2687_p6) }
 0x256   : > { %1756 = vst [vmem:[#allocation2 + $0x190] sm:$0xff] %v1692_v3  ;;  %v1420_v5 = vpop.f32.mrb[52].mxu1 }
 0x257   : > { %1757 = vst [vmem:[#allocation2 + $0x198] sm:$0xff] %v1693_v4  ;;  %v1613_v7 = vpop.f32.mrb[52].mxu0  ;;  %v1422_v9 = vpop.f32.mrb[53].mxu1  ;;  %v1841_v3 = vshrl.u32 (!%p2687_p6), %v1840_v1, 7  ;;  %v1915_v4 = vld [vmem:[%s3842_s24 + $0x8] sm:$0xff] (!%p2687_p6) }
 0x258   : > { %v1614_v8 = vadd.f32 %v1613_v7, %v1420_v5  ;;  %v1615_v11 = vpop.f32.mrb[53].mxu0  ;;  %v1424_v13 = vpop.f32.mrb[54].mxu1  ;;  %v1774_v5 = vld [vmem:[#allocation2] sm:$0xff] (!%p2687_p6) }
 0x259   : > { %v1616_v12 = vadd.f32 %v1615_v11, %v1422_v9  ;;  %v1617_v15 = vpop.f32.mrb[54].mxu0  ;;  %v1426_v18 = vpop.f32.mrb[55].mxu1  ;;  %v1838_v7 = vld [vmem:[%s350_s10] sm:$0x3] (!%p2687_p6)  ;;  %v1842_v9 = vsub.s32 (!%p2687_p6), 0, %v1841_v3  ;;  %v1946_v11 = vunpack.c.l.bf16 (!%p2687_p6), %v1914_v2 }
 0x25a   : > { %v1694_v16 = vadd.f32 %v1614_v8, %v476_v6  ;;  %v1618_v17 = vadd.f32 %v1617_v15, %v1424_v13  ;;  %v1619_v20 = vpop.f32.mrb[55].mxu0  ;;  %v1775_v6 = vld [vmem:[#allocation2 + $0x8] sm:$0xff] (!%p2687_p6)  ;;  %v1916_v8 = vld [vmem:[%s3842_s24 + $0x10] sm:$0xff] (!%p2687_p6)  ;;  %v1917_v15 = vld [vmem:[%s3842_s24 + $0x18] sm:$0xff] (!%p2687_p6) }
 0x25b   : > { %v1695_v21 = vadd.f32 %v1616_v12, %v477_v10  ;;  %v1620_v22 = vadd.f32 %v1619_v20, %v1426_v18  ;;  %v1846_v10 = vsub.s32 (!%p2687_p6), 1, %v1841_v3  ;;  %v1947_v12 = vunpack.c.h.bf16 (!%p2687_p6), %v1914_v2  ;;  %v1776_v13 = vld [vmem:[#allocation2 + $0x10] sm:$0xff] (!%p2687_p6)  ;;  %v1778_v18 = vld [vmem:[#allocation2 + $0x20] sm:$0xff] (!%p2687_p6) }
 0x25c   : > { %1758 = vst [vmem:[#allocation2 + $0x1a0] sm:$0xff] %v1694_v16  ;;  %v1696_v23 = vadd.f32 %v1618_v17, %v478_v14  ;;  %v1777_v14 = vld [vmem:[#allocation2 + $0x18] sm:$0xff] (!%p2687_p6)  ;;  %v1948_v16 = vunpack.c.l.bf16 (!%p2687_p6), %v1915_v4  ;;  %v1949_v17 = vunpack.c.h.bf16 (!%p2687_p6), %v1915_v4  ;;  %v1950_v20 = vunpack.c.l.bf16 (!%p2687_p6), %v1916_v8  ;;  %v1920_v4 = vld [vmem:[%s3842_s24 + $0x30] sm:$0xff] (!%p2687_p6) }
 0x25d   : > { %1759 = vst [vmem:[#allocation2 + $0x1a8] sm:$0xff] %v1695_v21  ;;  %v1697_v24 = vadd.f32 %v1620_v22, %v479_v19  ;;  %v1779_v19 = vld [vmem:[#allocation2 + $0x28] sm:$0xff] (!%p2687_p6)  ;;  %v1951_v21 = vunpack.c.h.bf16 (!%p2687_p6), %v1916_v8  ;;  %v1918_v22 = vld [vmem:[%s3842_s24 + $0x20] sm:$0xff] (!%p2687_p6) }
 0x25e   : > { %1760 = vst [vmem:[#allocation2 + $0x1b0] sm:$0xff] %v1696_v23  ;;  %v1430_v25 = vpop.f32.mrb[56].mxu1  ;;  %v4065_v23 = vrot.slane (!%p2687_p6), %v1838_v7, %v1842_v9  ;;  %v1788_v9 = vld [vmem:[#allocation2 + $0x70] sm:$0xff] (!%p2687_p6) }
 0x25f   : > { %1761 = vst [vmem:[#allocation2 + $0x1b8] sm:$0xff] %v1697_v24  ;;  %v1623_v27 = vpop.f32.mrb[56].mxu0  ;;  %v1432_v29 = vpop.f32.mrb[57].mxu1  ;;  %v4067_v24 = vrot.slane (!%p2687_p6), %v1838_v7, %v1846_v10  ;;  %v1789_v10 = vld [vmem:[#allocation2 + $0x78] sm:$0xff] (!%p2687_p6) }
 0x260   : > { %v1624_v28 = vadd.f32 %v1623_v27, %v1430_v25  ;;  %v1625_v31 = vpop.f32.mrb[57].mxu0  ;;  %v1434_v33 = vpop.f32.mrb[58].mxu1  ;;  %v1780_v25 = vld [vmem:[#allocation2 + $0x30] sm:$0xff] (!%p2687_p6)  ;;  %v1952_v27 = vunpack.c.l.bf16 (!%p2687_p6), %v1917_v15 }
 0x261   : > { %v1626_v32 = vadd.f32 %v1625_v31, %v1432_v29  ;;  %v1627_v35 = vpop.f32.mrb[58].mxu0  ;;  %v1436_v38 = vpop.f32.mrb[59].mxu1  ;;  %v1919_v29 = vld [vmem:[%s3842_s24 + $0x28] sm:$0xff] (!%p2687_p6)  ;;  %v1955_v31 = vunpack.c.h.bf16 (!%p2687_p6), %v1918_v22 }
 0x262   : > { %v1698_v36 = vadd.f32 %v1624_v28, %v480_v26  ;;  %v1628_v37 = vadd.f32 %v1627_v35, %v1434_v33  ;;  %v1629_v40 = vpop.f32.mrb[59].mxu0  ;;  %v1781_v26 = vld [vmem:[#allocation2 + $0x38] sm:$0xff] (!%p2687_p6)  ;;  %v1953_v28 = vunpack.c.h.bf16 (!%p2687_p6), %v1917_v15  ;;  %v1957_v33 = vunpack.c.h.bf16 (!%p2687_p6), %v1919_v29 }
 0x263   : > { %v1699_v41 = vadd.f32 %v1626_v32, %v481_v30  ;;  %v1630_v42 = vadd.f32 %v1629_v40, %v1436_v38  ;;  %v1954_v30 = vunpack.c.l.bf16 (!%p2687_p6), %v1918_v22  ;;  %v1956_v32 = vunpack.c.l.bf16 (!%p2687_p6), %v1919_v29 }
 0x264   : > { %1762 = vst [vmem:[#allocation2 + $0x1c0] sm:$0xff] %v1698_v36  ;;  %v1700_v43 = vadd.f32 %v1628_v37, %v482_v34  ;;  %v1850_v34 = vadd.f32 (!%p2687_p6), %v4065_v23, %v1774_v5  ;;  %v1851_v35 = vadd.f32 (!%p2687_p6), %v4067_v24, %v1775_v6  ;;  %v1852_v36 = vadd.f32 (!%p2687_p6), %v4065_v23, %v1776_v13 }
 0x265   : > { %1763 = vst [vmem:[#allocation2 + $0x1c8] sm:$0xff] %v1699_v41  ;;  %v1701_v44 = vadd.f32 %v1630_v42, %v483_v39  ;;  %v1853_v37 = vadd.f32 (!%p2687_p6), %v4067_v24, %v1777_v14  ;;  %v1854_v38 = vadd.f32 (!%p2687_p6), %v4065_v23, %v1778_v18  ;;  %v1855_v39 = vadd.f32 (!%p2687_p6), %v4067_v24, %v1779_v19  ;;  %v1921_v19 = vld [vmem:[%s3842_s24 + $0x38] sm:$0xff] (!%p2687_p6) }
 0x266   : > { %1764 = vst [vmem:[#allocation2 + $0x1d0] sm:$0xff] %v1700_v43  ;;  %v1440_v45 = vpop.f32.mrb[60].mxu1  ;;  %v1856_v40 = vadd.f32 (!%p2687_p6), %v4065_v23, %v1780_v25  ;;  %v1857_v41 = vadd.f32 (!%p2687_p6), %v4067_v24, %v1781_v26  ;;  %v2010_v42 = vadd.f32 (!%p2687_p6), %v1946_v11, %v1850_v34  ;;  %v2011_v43 = vadd.f32 (!%p2687_p6), %v1947_v12, %v1851_v35  ;;  %v1922_v34 = vld [vmem:[%s3842_s24 + $0x40] sm:$0xff] (!%p2687_p6) }
 0x267   : > { %1765 = vst [vmem:[#allocation2 + $0x1d8] sm:$0xff] %v1701_v44  ;;  %v1633_v47 = vpop.f32.mrb[60].mxu0  ;;  %v1442_v49 = vpop.f32.mrb[61].mxu1  ;;  %v2012_v44 = vadd.f32 (!%p2687_p6), %v1948_v16, %v1852_v36  ;;  %v1959_v18 = vunpack.c.h.bf16 (!%p2687_p6), %v1920_v4  ;;  %v1864_v25 = vadd.f32 (!%p2687_p6), %v4065_v23, %v1788_v9  ;;  %v1865_v26 = vadd.f32 (!%p2687_p6), %v4067_v24, %v1789_v10 }
 0x268   : > { %v1634_v48 = vadd.f32 %v1633_v47, %v1440_v45  ;;  %v1635_v51 = vpop.f32.mrb[61].mxu0  ;;  %v1444_v53 = vpop.f32.mrb[62].mxu1  ;;  %v2013_v45 = vadd.f32 (!%p2687_p6), %v1949_v17, %v1853_v37  ;;  %v2015_v47 = vadd.f32 (!%p2687_p6), %v1951_v21, %v1855_v39  ;;  %v1958_v17 = vunpack.c.l.bf16 (!%p2687_p6), %v1920_v4  ;;  %v1792_v37 = vld [vmem:[#allocation2 + $0x90] sm:$0xff] (!%p2687_p6)  ;;  %v1923_v39 = vld [vmem:[%s3842_s24 + $0x48] sm:$0xff] (!%p2687_p6) }
 0x269   : > { %v1636_v52 = vadd.f32 %v1635_v51, %v1442_v49  ;;  %v1637_v55 = vpop.f32.mrb[62].mxu0  ;;  %v1446_v58 = vpop.f32.mrb[63].mxu1  ;;  %1773 = sbr.rel (%p2687_p6) target bundleno = 690 (0x2b2), region = 56  ;;  %v2017_v49 = vadd.f32 (!%p2687_p6), %v1953_v28, %v1857_v41  ;;  %v1783_v51 = vld [vmem:[#allocation2 + $0x48] sm:$0xff] (!%p2687_p6)  ;;  %v1961_v35 = vunpack.c.h.bf16 (!%p2687_p6), %v1921_v19 }
 0x26a   : > { %v1702_v56 = vadd.f32 %v1634_v48, %v484_v46  ;;  %v1638_v57 = vadd.f32 %v1637_v55, %v1444_v53  ;;  %v1639_v60 = vpop.f32.mrb[63].mxu0  ;;  %v2014_v46 = vadd.f32 (!%p2687_p6), %v1950_v20, %v1854_v38  ;;  %v2016_v48 = vadd.f32 (!%p2687_p6), %v1952_v27, %v1856_v40  ;;  %v1790_v20 = vld [vmem:[#allocation2 + $0x80] sm:$0xff] (!%p2687_p6)  ;;  %v1791_v27 = vld [vmem:[#allocation2 + $0x88] sm:$0xff] (!%p2687_p6)  ;;  %v1793_v38 = vld [vmem:[#allocation2 + $0x98] sm:$0xff] (!%p2687_p6) }
 0x26b   : > { %v1703_v61 = vadd.f32 %v1636_v52, %v485_v50  ;;  %v1640_v62 = vadd.f32 %v1639_v60, %v1446_v58  ;;  %v1782_v50 = vld [vmem:[#allocation2 + $0x40] sm:$0xff] (!%p2687_p6)  ;;  %v2074_v52 = vmax.f32 (!%p2687_p6), %v2010_v42, 0.0  ;;  %v2075_v53 = vmax.f32 (!%p2687_p6), %v2011_v43, 0.0 }
 0x26c   : > { %1766 = vst [vmem:[#allocation2 + $0x1e0] sm:$0xff] %v1702_v56  ;;  %v1704_v63 = vadd.f32 %v1638_v57, %v486_v54  ;;  %v2076_v54 = vmax.f32 (!%p2687_p6), %v2012_v44, 0.0  ;;  %v2077_v55 = vmax.f32 (!%p2687_p6), %v2013_v45, 0.0  ;;  %v1784_v56 = vld [vmem:[#allocation2 + $0x50] sm:$0xff] (!%p2687_p6)  ;;  %v1785_v57 = vld [vmem:[#allocation2 + $0x58] sm:$0xff] (!%p2687_p6)  ;;  %v2078_v58 = vmax.f32 (!%p2687_p6), %v2014_v46, 0.0 }
 0x26d   : > { %1767 = vst [vmem:[#allocation2 + $0x1e8] sm:$0xff] %v1703_v61  ;;  %v1705_v0 = vadd.f32 %v1640_v62, %v487_v59  ;;  %v2079_v59 = vmax.f32 (!%p2687_p6), %v2015_v47, 0.0  ;;  %v2080_v60 = vmax.f32 (!%p2687_p6), %v2016_v48, 0.0  ;;  %v2081_v61 = vmax.f32 (!%p2687_p6), %v2017_v49, 0.0  ;;  %v1786_v62 = vld [vmem:[#allocation2 + $0x60] sm:$0xff] (!%p2687_p6)  ;;  %v1795_v49 = vld [vmem:[#allocation2 + $0xa8] sm:$0xff] (!%p2687_p6) }
 0x26e   : > { %1768 = vst [vmem:[#allocation2 + $0x1f0] sm:$0xff] %v1704_v63  ;;  %v1787_v63 = vld [vmem:[#allocation2 + $0x68] sm:$0xff] (!%p2687_p6)  ;;  %v2731_v1 = vpack.c.bf16 (!%p2687_p6), %v2077_v55, %v2076_v54  ;;  %v1858_v2 = vadd.f32 (!%p2687_p6), %v4065_v23, %v1782_v50  ;;  %v1859_v3 = vadd.f32 (!%p2687_p6), %v4067_v24, %v1783_v51  ;;  %v1860_v7 = vadd.f32 (!%p2687_p6), %v4065_v23, %v1784_v56  ;;  %v1794_v48 = vld [vmem:[#allocation2 + $0xa0] sm:$0xff] (!%p2687_p6)  ;;  %v1924_v54 = vld [vmem:[%s3842_s24 + $0x50] sm:$0xff] (!%p2687_p6) }
 0x26f   : > { %1769 = vst [vmem:[#allocation2 + $0x1f8] sm:$0xff] %v1705_v0  ;;  %v2730_v0 = vpack.c.bf16 (!%p2687_p6), %v2075_v53, %v2074_v52  ;;  %v2732_v5 = vpack.c.bf16 (!%p2687_p6), %v2079_v59, %v2078_v58  ;;  %v2733_v6 = vpack.c.bf16 (!%p2687_p6), %v2081_v61, %v2080_v60  ;;  %v1861_v8 = vadd.f32 (!%p2687_p6), %v4067_v24, %v1785_v57  ;;  %v1796_v59 = vld [vmem:[#allocation2 + $0xb0] sm:$0xff] (!%p2687_p6) }
 0x270   : > { %2331 = vst [vmem:[%s3859_s29 + $0x8] sm:$0xff] %v2731_v1  ;;  %v2018_v11 = vadd.f32 %v1954_v30, %v1858_v2  ;;  %v2019_v12 = vadd.f32 %v1955_v31, %v1859_v3  ;;  %v1862_v13 = vadd.f32 %v4065_v23, %v1786_v62  ;;  %v1863_v14 = vadd.f32 %v4067_v24, %v1787_v63  ;;  %v1925_v1 = vld [vmem:[%s3842_s24 + $0x58] sm:$0xff] }
 0x271   : > { %2330 = vst [vmem:[%s3859_s29] sm:$0xff] %v2730_v0  ;;  %2332 = vst [vmem:[%s3859_s29 + $0x10] sm:$0xff] %v2732_v5  ;;  %v2020_v15 = vadd.f32 %v1956_v32, %v1860_v7  ;;  %v2021_v16 = vadd.f32 %v1957_v33, %v1861_v8  ;;  %v1960_v33 = vunpack.c.l.bf16 %v1921_v19  ;;  %v1866_v36 = vadd.f32 %v4065_v23, %v1790_v20  ;;  %v1797_v0 = vld [vmem:[#allocation2 + $0xb8] sm:$0xff] }
 0x272   : > { %2333 = vst [vmem:[%s3859_s29 + $0x18] sm:$0xff] %v2733_v6  ;;  %v2082_v21 = vmax.f32 %v2018_v11, 0.0  ;;  %v2083_v22 = vmax.f32 %v2019_v12, 0.0  ;;  %v2022_v30 = vadd.f32 %v1958_v17, %v1862_v13  ;;  %v2023_v31 = vadd.f32 %v1959_v18, %v1863_v14  ;;  %v1798_v6 = vld [vmem:[#allocation2 + $0xc0] sm:$0xff]  ;;  %v1799_v11 = vld [vmem:[#allocation2 + $0xc8] sm:$0xff] }
 0x273   : > { %v2084_v28 = vmax.f32 %v2020_v15, 0.0  ;;  %v2085_v29 = vmax.f32 %v2021_v16, 0.0  ;;  %v1867_v43 = vadd.f32 %v4067_v24, %v1791_v27  ;;  %v2024_v44 = vadd.f32 %v1960_v33, %v1864_v25  ;;  %v1926_v12 = vld [vmem:[%s3842_s24 + $0x60] sm:$0xff] }
 0x274   : > { %v2734_v32 = vpack.c.bf16 %v2083_v22, %v2082_v21  ;;  %v2086_v41 = vmax.f32 %v2022_v30, 0.0  ;;  %v2087_v42 = vmax.f32 %v2023_v31, 0.0  ;;  %v2025_v45 = vadd.f32 %v1961_v35, %v1865_v26  ;;  %v1800_v21 = vld [vmem:[#allocation2 + $0xd0] sm:$0xff]  ;;  %v1801_v22 = vld [vmem:[#allocation2 + $0xd8] sm:$0xff]  ;;  %v1802_v33 = vld [vmem:[#allocation2 + $0xe0] sm:$0xff] }
 0x275   : > { %v2735_v40 = vpack.c.bf16 %v2085_v29, %v2084_v28  ;;  %v1962_v46 = vunpack.c.l.bf16 %v1922_v34  ;;  %v1963_v47 = vunpack.c.h.bf16 %v1922_v34  ;;  %v1868_v51 = vadd.f32 %v4065_v23, %v1792_v37  ;;  %v1927_v29 = vld [vmem:[%s3842_s24 + $0x68] sm:$0xff] }
 0x276   : > { %2334 = vst [vmem:[%s3859_s29 + $0x20] sm:$0xff] %v2734_v32  ;;  %v2736_v50 = vpack.c.bf16 %v2087_v42, %v2086_v41  ;;  %v1869_v52 = vadd.f32 %v4067_v24, %v1793_v38  ;;  %v1964_v53 = vunpack.c.l.bf16 %v1923_v39  ;;  %v2088_v55 = vmax.f32 %v2024_v44, 0.0  ;;  %v1803_v35 = vld [vmem:[#allocation2 + $0xe8] sm:$0xff] }
 0x277   : > { %2335 = vst [vmem:[%s3859_s29 + $0x28] sm:$0xff] %v2735_v40  ;;  %v2089_v56 = vmax.f32 %v2025_v45, 0.0  ;;  %v2026_v57 = vadd.f32 %v1962_v46, %v1866_v36  ;;  %v2027_v58 = vadd.f32 %v1963_v47, %v1867_v43  ;;  %v1965_v60 = vunpack.c.h.bf16 %v1923_v39  ;;  %v1928_v40 = vld [vmem:[%s3842_s24 + $0x70] sm:$0xff]  ;;  %v1805_v46 = vld [vmem:[#allocation2 + $0xf8] sm:$0xff] }
 0x278   : > { %2336 = vst [vmem:[%s3859_s29 + $0x30] sm:$0xff] %v2736_v50  ;;  %v2028_v61 = vadd.f32 %v1964_v53, %v1868_v51  ;;  %v1870_v62 = vadd.f32 %v4065_v23, %v1794_v48  ;;  %v1871_v63 = vadd.f32 %v4067_v24, %v1795_v49  ;;  %v1966_v5 = vunpack.c.l.bf16 %v1924_v54  ;;  %v1804_v45 = vld [vmem:[#allocation2 + $0xf0] sm:$0xff]  ;;  %v1929_v51 = vld [vmem:[%s3842_s24 + $0x78] sm:$0xff] }
 0x279   : > { %v2737_v2 = vpack.c.bf16 %v2089_v56, %v2088_v55  ;;  %v2090_v3 = vmax.f32 %v2026_v57, 0.0  ;;  %v2091_v4 = vmax.f32 %v2027_v58, 0.0  ;;  %v2029_v7 = vadd.f32 %v1965_v60, %v1869_v52  ;;  %v1806_v56 = vld [vmem:[#allocation2 + $0x100] sm:$0xff] }
 0x27a   : > { %v2092_v8 = vmax.f32 %v2028_v61, 0.0  ;;  %v1967_v9 = vunpack.c.h.bf16 %v1924_v54  ;;  %v1872_v10 = vadd.f32 %v4065_v23, %v1796_v59  ;;  %v2030_v14 = vadd.f32 %v1966_v5, %v1870_v62  ;;  %v1807_v61 = vld [vmem:[#allocation2 + $0x108] sm:$0xff]  ;;  %v1930_v62 = vld [vmem:[%s3842_s24 + $0x80] sm:$0xff] }
 0x27b   : > { %2337 = vst [vmem:[%s3859_s29 + $0x38] sm:$0xff] %v2737_v2  ;;  %v2738_v13 = vpack.c.bf16 %v2091_v4, %v2090_v3  ;;  %v1873_v15 = vadd.f32 %v4067_v24, %v1797_v0  ;;  %v1968_v16 = vunpack.c.l.bf16 %v1925_v1  ;;  %v2093_v17 = vmax.f32 %v2029_v7, 0.0  ;;  %v1808_v7 = vld [vmem:[#allocation2 + $0x110] sm:$0xff] }
 0x27c   : > { %v2031_v18 = vadd.f32 %v1967_v9, %v1871_v63  ;;  %v1969_v19 = vunpack.c.h.bf16 %v1925_v1  ;;  %v1874_v20 = vadd.f32 %v4065_v23, %v1798_v6  ;;  %v2094_v25 = vmax.f32 %v2030_v14, 0.0 }
 0x27d   : > { %2338 = vst [vmem:[%s3859_s29 + $0x40] sm:$0xff] %v2738_v13  ;;  %v2032_v26 = vadd.f32 %v1968_v16, %v1872_v10  ;;  %v1875_v27 = vadd.f32 %v4067_v24, %v1799_v11  ;;  %v1970_v28 = vunpack.c.l.bf16 %v1926_v12  ;;  %v2739_v30 = vpack.c.bf16 %v2093_v17, %v2092_v8  ;;  %v1809_v8 = vld [vmem:[#allocation2 + $0x118] sm:$0xff]  ;;  %v1931_v13 = vld [vmem:[%s3842_s24 + $0x88] sm:$0xff] }
 0x27e   : > { %v2095_v31 = vmax.f32 %v2031_v18, 0.0  ;;  %v2033_v34 = vadd.f32 %v1969_v19, %v1873_v15  ;;  %v1971_v32 = vunpack.c.h.bf16 %v1926_v12  ;;  %v1876_v38 = vadd.f32 %v4065_v23, %v1800_v21  ;;  %v1810_v18 = vld [vmem:[#allocation2 + $0x120] sm:$0xff]  ;;  %v1811_v19 = vld [vmem:[#allocation2 + $0x128] sm:$0xff] }
 0x27f   : > { %v2096_v36 = vmax.f32 %v2032_v26, 0.0  ;;  %v2034_v37 = vadd.f32 %v1970_v28, %v1874_v20  ;;  %v1877_v39 = vadd.f32 %v4067_v24, %v1801_v22  ;;  %2339 = vst [vmem:[%s3859_s29 + $0x48] sm:$0xff] %v2739_v30  ;;  %v1972_v44 = vunpack.c.l.bf16 %v1927_v29  ;;  %v1932_v26 = vld [vmem:[%s3842_s24 + $0x90] sm:$0xff] }
 0x280   : > { %v2740_v41 = vpack.c.bf16 %v2095_v31, %v2094_v25  ;;  %v2097_v42 = vmax.f32 %v2033_v34, 0.0  ;;  %v2035_v43 = vadd.f32 %v1971_v32, %v1875_v27  ;;  %v1973_v48 = vunpack.c.h.bf16 %v1927_v29  ;;  %v1812_v31 = vld [vmem:[#allocation2 + $0x130] sm:$0xff]  ;;  %v1813_v34 = vld [vmem:[#allocation2 + $0x138] sm:$0xff] }
 0x281   : > { %v2098_v47 = vmax.f32 %v2034_v37, 0.0  ;;  %v1878_v49 = vadd.f32 %v4065_v23, %v1802_v33  ;;  %v1879_v50 = vadd.f32 %v4067_v24, %v1803_v35  ;;  %v2036_v54 = vadd.f32 %v1972_v44, %v1876_v38  ;;  %v1933_v37 = vld [vmem:[%s3842_s24 + $0x98] sm:$0xff] }
 0x282   : > { %2340 = vst [vmem:[%s3859_s29 + $0x50] sm:$0xff] %v2740_v41  ;;  %v2741_v52 = vpack.c.bf16 %v2097_v42, %v2096_v36  ;;  %v2099_v53 = vmax.f32 %v2035_v43, 0.0  ;;  %v1974_v55 = vunpack.c.l.bf16 %v1928_v40  ;;  %v2037_v57 = vadd.f32 %v1973_v48, %v1877_v39  ;;  %v1814_v42 = vld [vmem:[#allocation2 + $0x140] sm:$0xff] }
 0x283   : > { %v1975_v58 = vunpack.c.h.bf16 %v1928_v40  ;;  %v1880_v59 = vadd.f32 %v4065_v23, %v1804_v45  ;;  %v1881_v60 = vadd.f32 %v4067_v24, %v1805_v46  ;;  %v2100_v0 = vmax.f32 %v2036_v54, 0.0  ;;  %v1934_v48 = vld [vmem:[%s3842_s24 + $0xa0] sm:$0xff] }
 0x284   : > { %2341 = vst [vmem:[%s3859_s29 + $0x58] sm:$0xff] %v2741_v52  ;;  %v2742_v63 = vpack.c.bf16 %v2099_v53, %v2098_v47  ;;  %v2038_v1 = vadd.f32 %v1974_v55, %v1878_v49  ;;  %v1976_v2 = vunpack.c.l.bf16 %v1929_v51  ;;  %v2101_v3 = vmax.f32 %v2037_v57, 0.0  ;;  %v1815_v47 = vld [vmem:[#allocation2 + $0x148] sm:$0xff]  ;;  %v1816_v57 = vld [vmem:[#allocation2 + $0x150] sm:$0xff] }
 0x285   : > { %v2039_v4 = vadd.f32 %v1975_v58, %v1879_v50  ;;  %v1977_v5 = vunpack.c.h.bf16 %v1929_v51  ;;  %v1882_v6 = vadd.f32 %v4065_v23, %v1806_v56  ;;  %v1883_v11 = vadd.f32 %v4067_v24, %v1807_v61  ;;  %v1817_v58 = vld [vmem:[#allocation2 + $0x158] sm:$0xff] }
 0x286   : > { %2342 = vst [vmem:[%s3859_s29 + $0x60] sm:$0xff] %v2742_v63  ;;  %v2102_v9 = vmax.f32 %v2038_v1, 0.0  ;;  %v2040_v10 = vadd.f32 %v1976_v2, %v1880_v59  ;;  %v1978_v12 = vunpack.c.l.bf16 %v1930_v62  ;;  %v2743_v14 = vpack.c.bf16 %v2101_v3, %v2100_v0  ;;  %v1935_v63 = vld [vmem:[%s3842_s24 + $0xa8] sm:$0xff] }
 0x287   : > { %v2103_v15 = vmax.f32 %v2039_v4, 0.0  ;;  %v2041_v16 = vadd.f32 %v1977_v5, %v1881_v60  ;;  %v1979_v17 = vunpack.c.h.bf16 %v1930_v62  ;;  %v1884_v22 = vadd.f32 %v4065_v23, %v1808_v7  ;;  %v1818_v4 = vld [vmem:[#allocation2 + $0x160] sm:$0xff]  ;;  %v1819_v5 = vld [vmem:[#allocation2 + $0x168] sm:$0xff] }
 0x288   : > { %v2104_v20 = vmax.f32 %v2040_v10, 0.0  ;;  %v2042_v21 = vadd.f32 %v1978_v12, %v1882_v6  ;;  %v1885_v25 = vadd.f32 %v4067_v24, %v1809_v8  ;;  %2343 = vst [vmem:[%s3859_s29 + $0x68] sm:$0xff] %v2743_v14  ;;  %v1980_v30 = vunpack.c.l.bf16 %v1931_v13  ;;  %v1936_v10 = vld [vmem:[%s3842_s24 + $0xb0] sm:$0xff] }
 0x289   : > { %v2744_v27 = vpack.c.bf16 %v2103_v15, %v2102_v9  ;;  %v2105_v28 = vmax.f32 %v2041_v16, 0.0  ;;  %v2043_v29 = vadd.f32 %v1979_v17, %v1883_v11  ;;  %v1981_v33 = vunpack.c.h.bf16 %v1931_v13  ;;  %v1820_v15 = vld [vmem:[#allocation2 + $0x170] sm:$0xff]  ;;  %v1821_v16 = vld [vmem:[#allocation2 + $0x178] sm:$0xff] }
 0x28a   : > { %v2106_v32 = vmax.f32 %v2042_v21, 0.0  ;;  %v1886_v35 = vadd.f32 %v4065_v23, %v1810_v18  ;;  %v1887_v36 = vadd.f32 %v4067_v24, %v1811_v19  ;;  %v2044_v40 = vadd.f32 %v1980_v30, %v1884_v22  ;;  %v1937_v21 = vld [vmem:[%s3842_s24 + $0xb8] sm:$0xff] }
 0x28b   : > { %2344 = vst [vmem:[%s3859_s29 + $0x70] sm:$0xff] %v2744_v27  ;;  %v2745_v38 = vpack.c.bf16 %v2105_v28, %v2104_v20  ;;  %v2107_v39 = vmax.f32 %v2043_v29, 0.0  ;;  %v1982_v41 = vunpack.c.l.bf16 %v1932_v26  ;;  %v2045_v43 = vadd.f32 %v1981_v33, %v1885_v25  ;;  %v1822_v28 = vld [vmem:[#allocation2 + $0x180] sm:$0xff] }
 0x28c   : > { %v1983_v44 = vunpack.c.h.bf16 %v1932_v26  ;;  %v1888_v45 = vadd.f32 %v4065_v23, %v1812_v31  ;;  %v1889_v46 = vadd.f32 %v4067_v24, %v1813_v34  ;;  %v2108_v50 = vmax.f32 %v2044_v40, 0.0  ;;  %v1938_v33 = vld [vmem:[%s3842_s24 + $0xc0] sm:$0xff] }
 0x28d   : > { %2345 = vst [vmem:[%s3859_s29 + $0x78] sm:$0xff] %v2745_v38  ;;  %v2746_v49 = vpack.c.bf16 %v2107_v39, %v2106_v32  ;;  %v2046_v51 = vadd.f32 %v1982_v41, %v1886_v35  ;;  %v1984_v52 = vunpack.c.l.bf16 %v1933_v37  ;;  %v2109_v53 = vmax.f32 %v2045_v43, 0.0  ;;  %v1823_v32 = vld [vmem:[#allocation2 + $0x188] sm:$0xff]  ;;  %v1824_v43 = vld [vmem:[#allocation2 + $0x190] sm:$0xff] }
 0x28e   : > { %v2047_v54 = vadd.f32 %v1983_v44, %v1887_v36  ;;  %v1985_v55 = vunpack.c.h.bf16 %v1933_v37  ;;  %v1890_v56 = vadd.f32 %v4065_v23, %v1814_v42  ;;  %v1891_v61 = vadd.f32 %v4067_v24, %v1815_v47  ;;  %v1825_v44 = vld [vmem:[#allocation2 + $0x198] sm:$0xff] }
 0x28f   : > { %2346 = vst [vmem:[%s3859_s29 + $0x80] sm:$0xff] %v2746_v49  ;;  %v2110_v59 = vmax.f32 %v2046_v51, 0.0  ;;  %v2048_v60 = vadd.f32 %v1984_v52, %v1888_v45  ;;  %v1986_v62 = vunpack.c.l.bf16 %v1934_v48  ;;  %v2747_v0 = vpack.c.bf16 %v2109_v53, %v2108_v50  ;;  %v1939_v49 = vld [vmem:[%s3842_s24 + $0xc8] sm:$0xff] }
 0x290   : > { %v2111_v1 = vmax.f32 %v2047_v54, 0.0  ;;  %v2049_v2 = vadd.f32 %v1985_v55, %v1889_v46  ;;  %v1987_v3 = vunpack.c.h.bf16 %v1934_v48  ;;  %v1892_v8 = vadd.f32 %v4065_v23, %v1816_v57  ;;  %v1826_v54 = vld [vmem:[#allocation2 + $0x1a0] sm:$0xff]  ;;  %v1827_v55 = vld [vmem:[#allocation2 + $0x1a8] sm:$0xff] }
 0x291   : > { %v2112_v6 = vmax.f32 %v2048_v60, 0.0  ;;  %v2050_v7 = vadd.f32 %v1986_v62, %v1890_v56  ;;  %v1893_v9 = vadd.f32 %v4067_v24, %v1817_v58  ;;  %2347 = vst [vmem:[%s3859_s29 + $0x88] sm:$0xff] %v2747_v0  ;;  %v1988_v14 = vunpack.c.l.bf16 %v1935_v63  ;;  %v1940_v60 = vld [vmem:[%s3842_s24 + $0xd0] sm:$0xff] }
 0x292   : > { %v2748_v11 = vpack.c.bf16 %v2111_v1, %v2110_v59  ;;  %v2113_v12 = vmax.f32 %v2049_v2, 0.0  ;;  %v2051_v13 = vadd.f32 %v1987_v3, %v1891_v61  ;;  %v1989_v18 = vunpack.c.h.bf16 %v1935_v63  ;;  %v1828_v1 = vld [vmem:[#allocation2 + $0x1b0] sm:$0xff]  ;;  %v1829_v2 = vld [vmem:[#allocation2 + $0x1b8] sm:$0xff] }
 0x293   : > { %v2114_v17 = vmax.f32 %v2050_v7, 0.0  ;;  %v1894_v19 = vadd.f32 %v4065_v23, %v1818_v4  ;;  %v1895_v20 = vadd.f32 %v4067_v24, %v1819_v5  ;;  %v2052_v26 = vadd.f32 %v1988_v14, %v1892_v8  ;;  %v1941_v7 = vld [vmem:[%s3842_s24 + $0xd8] sm:$0xff] }
 0x294   : > { %2348 = vst [vmem:[%s3859_s29 + $0x90] sm:$0xff] %v2748_v11  ;;  %v2749_v22 = vpack.c.bf16 %v2113_v12, %v2112_v6  ;;  %v2115_v25 = vmax.f32 %v2051_v13, 0.0  ;;  %v1990_v27 = vunpack.c.l.bf16 %v1936_v10  ;;  %v2053_v29 = vadd.f32 %v1989_v18, %v1893_v9  ;;  %v1830_v12 = vld [vmem:[#allocation2 + $0x1c0] sm:$0xff] }
 0x295   : > { %v1991_v30 = vunpack.c.h.bf16 %v1936_v10  ;;  %v1896_v31 = vadd.f32 %v4065_v23, %v1820_v15  ;;  %v1897_v34 = vadd.f32 %v4067_v24, %v1821_v16  ;;  %v2116_v36 = vmax.f32 %v2052_v26, 0.0  ;;  %v1942_v18 = vld [vmem:[%s3842_s24 + $0xe0] sm:$0xff] }
 0x296   : > { %2349 = vst [vmem:[%s3859_s29 + $0x98] sm:$0xff] %v2749_v22  ;;  %v2750_v35 = vpack.c.bf16 %v2115_v25, %v2114_v17  ;;  %v2054_v37 = vadd.f32 %v1990_v27, %v1894_v19  ;;  %v1992_v38 = vunpack.c.l.bf16 %v1937_v21  ;;  %v2117_v39 = vmax.f32 %v2053_v29, 0.0  ;;  %v1831_v17 = vld [vmem:[#allocation2 + $0x1c8] sm:$0xff]  ;;  %v1832_v29 = vld [vmem:[#allocation2 + $0x1d0] sm:$0xff] }
 0x297   : > { %v2055_v40 = vadd.f32 %v1991_v30, %v1895_v20  ;;  %v1993_v41 = vunpack.c.h.bf16 %v1937_v21  ;;  %v1898_v42 = vadd.f32 %v4065_v23, %v1822_v28  ;;  %v1899_v47 = vadd.f32 %v4067_v24, %v1823_v32  ;;  %v1833_v30 = vld [vmem:[#allocation2 + $0x1d8] sm:$0xff] }
 0x298   : > { %2350 = vst [vmem:[%s3859_s29 + $0xa0] sm:$0xff] %v2750_v35  ;;  %v2118_v45 = vmax.f32 %v2054_v37, 0.0  ;;  %v2056_v46 = vadd.f32 %v1992_v38, %v1896_v31  ;;  %v1994_v48 = vunpack.c.l.bf16 %v1938_v33  ;;  %v2751_v50 = vpack.c.bf16 %v2117_v39, %v2116_v36  ;;  %v1943_v35 = vld [vmem:[%s3842_s24 + $0xe8] sm:$0xff] }
 0x299   : > { %v2119_v51 = vmax.f32 %v2055_v40, 0.0  ;;  %v2057_v52 = vadd.f32 %v1993_v41, %v1897_v34  ;;  %v1995_v53 = vunpack.c.h.bf16 %v1938_v33  ;;  %v1900_v58 = vadd.f32 %v4065_v23, %v1824_v43  ;;  %v1834_v40 = vld [vmem:[#allocation2 + $0x1e0] sm:$0xff]  ;;  %v1835_v41 = vld [vmem:[#allocation2 + $0x1e8] sm:$0xff] }
 0x29a   : > { %v2120_v56 = vmax.f32 %v2056_v46, 0.0  ;;  %v2058_v57 = vadd.f32 %v1994_v48, %v1898_v42  ;;  %v1901_v59 = vadd.f32 %v4067_v24, %v1825_v44  ;;  %2351 = vst [vmem:[%s3859_s29 + $0xa8] sm:$0xff] %v2751_v50  ;;  %v1996_v0 = vunpack.c.l.bf16 %v1939_v49  ;;  %v1944_v46 = vld [vmem:[%s3842_s24 + $0xf0] sm:$0xff] }
 0x29b   : > { %v2752_v61 = vpack.c.bf16 %v2119_v51, %v2118_v45  ;;  %v2121_v62 = vmax.f32 %v2057_v52, 0.0  ;;  %v2059_v63 = vadd.f32 %v1995_v53, %v1899_v47  ;;  %v1997_v4 = vunpack.c.h.bf16 %v1939_v49  ;;  %v1836_v51 = vld [vmem:[#allocation2 + $0x1f0] sm:$0xff]  ;;  %v1837_v52 = vld [vmem:[#allocation2 + $0x1f8] sm:$0xff] }
 0x29c   : > { %v2122_v3 = vmax.f32 %v2058_v57, 0.0  ;;  %v1902_v5 = vadd.f32 %v4065_v23, %v1826_v54  ;;  %v1903_v6 = vadd.f32 %v4067_v24, %v1827_v55  ;;  %v2060_v10 = vadd.f32 %v1996_v0, %v1900_v58  ;;  %v1945_v57 = vld [vmem:[%s3842_s24 + $0xf8] sm:$0xff] }
 0x29d   : > { %2352 = vst [vmem:[%s3859_s29 + $0xb0] sm:$0xff] %v2752_v61  ;;  %v2753_v8 = vpack.c.bf16 %v2121_v62, %v2120_v56  ;;  %v2123_v9 = vmax.f32 %v2059_v63, 0.0  ;;  %v1998_v11 = vunpack.c.l.bf16 %v1940_v60  ;;  %v2061_v13 = vadd.f32 %v1997_v4, %v1901_v59 }
 0x29e   : > { %v1999_v14 = vunpack.c.h.bf16 %v1940_v60  ;;  %v1904_v15 = vadd.f32 %v4065_v23, %v1828_v1  ;;  %v1905_v16 = vadd.f32 %v4067_v24, %v1829_v2  ;;  %v2124_v20 = vmax.f32 %v2060_v10, 0.0 }
 0x29f   : > { %2353 = vst [vmem:[%s3859_s29 + $0xb8] sm:$0xff] %v2753_v8  ;;  %v2754_v19 = vpack.c.bf16 %v2123_v9, %v2122_v3  ;;  %v2062_v21 = vadd.f32 %v1998_v11, %v1902_v5  ;;  %v2000_v22 = vunpack.c.l.bf16 %v1941_v7  ;;  %v2125_v25 = vmax.f32 %v2061_v13, 0.0 }
 0x2a0   : > { %v2063_v26 = vadd.f32 %v1999_v14, %v1903_v6  ;;  %v2001_v27 = vunpack.c.h.bf16 %v1941_v7  ;;  %v1906_v28 = vadd.f32 %v4065_v23, %v1830_v12  ;;  %v1907_v32 = vadd.f32 %v4067_v24, %v1831_v17 }
 0x2a1   : > { %2354 = vst [vmem:[%s3859_s29 + $0xc0] sm:$0xff] %v2754_v19  ;;  %v2126_v31 = vmax.f32 %v2062_v21, 0.0  ;;  %v2064_v34 = vadd.f32 %v2000_v22, %v1904_v15  ;;  %v2002_v33 = vunpack.c.l.bf16 %v1942_v18  ;;  %v2755_v36 = vpack.c.bf16 %v2125_v25, %v2124_v20 }
 0x2a2   : > { %v2127_v37 = vmax.f32 %v2063_v26, 0.0  ;;  %v2065_v38 = vadd.f32 %v2001_v27, %v1905_v16  ;;  %v2003_v39 = vunpack.c.h.bf16 %v1942_v18  ;;  %v1908_v44 = vadd.f32 %v4065_v23, %v1832_v29 }
 0x2a3   : > { %v2128_v42 = vmax.f32 %v2064_v34, 0.0  ;;  %v2066_v43 = vadd.f32 %v2002_v33, %v1906_v28  ;;  %v1909_v45 = vadd.f32 %v4067_v24, %v1833_v30  ;;  %2355 = vst [vmem:[%s3859_s29 + $0xc8] sm:$0xff] %v2755_v36  ;;  %v2004_v50 = vunpack.c.l.bf16 %v1943_v35 }
 0x2a4   : > { %v2756_v47 = vpack.c.bf16 %v2127_v37, %v2126_v31  ;;  %v2129_v48 = vmax.f32 %v2065_v38, 0.0  ;;  %v2067_v49 = vadd.f32 %v2003_v39, %v1907_v32  ;;  %v2005_v54 = vunpack.c.h.bf16 %v1943_v35 }
 0x2a5   : > { %v2130_v53 = vmax.f32 %v2066_v43, 0.0  ;;  %v1910_v55 = vadd.f32 %v4065_v23, %v1834_v40  ;;  %v1911_v56 = vadd.f32 %v4067_v24, %v1835_v41  ;;  %v2068_v60 = vadd.f32 %v2004_v50, %v1908_v44 }
 0x2a6   : > { %2356 = vst [vmem:[%s3859_s29 + $0xd0] sm:$0xff] %v2756_v47  ;;  %v2757_v58 = vpack.c.bf16 %v2129_v48, %v2128_v42  ;;  %v2131_v59 = vmax.f32 %v2067_v49, 0.0  ;;  %v2006_v61 = vunpack.c.l.bf16 %v1944_v46  ;;  %v2069_v62 = vadd.f32 %v2005_v54, %v1909_v45 }
 0x2a7   : > { %v2007_v63 = vunpack.c.h.bf16 %v1944_v46  ;;  %v1912_v0 = vadd.f32 %v4065_v23, %v1836_v51  ;;  %v1913_v1 = vadd.f32 %v4067_v24, %v1837_v52  ;;  %v2132_v3 = vmax.f32 %v2068_v60, 0.0 }
 0x2a8   : > { %2357 = vst [vmem:[%s3859_s29 + $0xd8] sm:$0xff] %v2757_v58  ;;  %v2758_v2 = vpack.c.bf16 %v2131_v59, %v2130_v53  ;;  %v2070_v4 = vadd.f32 %v2006_v61, %v1910_v55  ;;  %v2008_v5 = vunpack.c.l.bf16 %v1945_v57  ;;  %v2133_v6 = vmax.f32 %v2069_v62, 0.0 }
 0x2a9   : > { %v2071_v7 = vadd.f32 %v2007_v63, %v1911_v56  ;;  %v2009_v8 = vunpack.c.h.bf16 %v1945_v57 }
 0x2aa   : > { %2358 = vst [vmem:[%s3859_s29 + $0xe0] sm:$0xff] %v2758_v2  ;;  %v2134_v9 = vmax.f32 %v2070_v4, 0.0  ;;  %v2072_v10 = vadd.f32 %v2008_v5, %v1912_v0  ;;  %v2759_v11 = vpack.c.bf16 %v2133_v6, %v2132_v3 }
 0x2ab   : > { %v2135_v12 = vmax.f32 %v2071_v7, 0.0  ;;  %v2073_v13 = vadd.f32 %v2009_v8, %v1913_v1 }
 0x2ac   : > { %v2136_v23 = vmax.f32 %v2072_v10, 0.0  ;;  %2359 = vst [vmem:[%s3859_s29 + $0xe8] sm:$0xff] %v2759_v11 }
 0x2ad   : > { %v2760_v24 = vpack.c.bf16 %v2135_v12, %v2134_v9  ;;  %v2137_v14 = vmax.f32 %v2073_v13, 0.0 }
 0x2af   : > { %2360 = vst [vmem:[%s3859_s29 + $0xf0] sm:$0xff] %v2760_v24  ;;  %v2761_v15 = vpack.c.bf16 %v2137_v14, %v2136_v23 }
 0x2b1   : > { %2361 = vst [vmem:[%s3859_s29 + $0xf8] sm:$0xff] %v2761_v15 }
 0x2b2 PF: > { %s4358_s9 = sld [smem:[#allocation17_spill]]  ;;  %s2379_s7 = sshll.u32 %s3859_s29, 4  ;;  %s4195_s7 = int_to_ptr.vmem [resolvable:$true] %s2379_s7 }
 0x2b3   : > { %s4359_s21 = sld [smem:[#allocation27_spill]]  ;;  %s4204_s4 = scalar_lea.sflag [#allocation5], %s302_s5 }
 0x2b4   : > { %s3270_s26 = scalar_lea.vmem %s4195_s7, 4096  ;;  %p4361_p10 = scmp.ne.s32.totalorder %s4341_s18, 0 }
 0x2b5   : > { %p3271_p13 = scmp.ne.s32.totalorder %s4195_s7, %s3270_s26 }
 0x2b7   : > { %p3272_p8 = pnand %p3271_p13, %p4361_p10 }
 0x2b8   : > { %s2762_s11 = sshll.u32 %s4358_s9, 7 }
 0x2b9   : > { %s2376_s24 = sadd.s32 %s2762_s11, %s3849_s14  ;;  %s4360_s10 = smov %s4359_s21 }
 0x2ba   : > { %s2724_s19 = sshll.u32 %s2376_s24, 6  ;;  %p3273_p0 = pneg %p3272_p8 }
 0x2bb   : > { %s4200_s0 = scalar_lea.hbm %s4359_s21, %s2724_s19  ;;  %s3451_s14 = smov [#allocation9]  }
 0x2bc   : > { %s3274_s29 = sshll.u32 %s3451_s14, 4  ;;  %s3275_s29 = int_to_ptr.vmem [resolvable:$false] %s3274_s29 }
 0x2bd   : > { %s3276_s2 = scalar_lea.vmem %s3275_s29, 8192  ;;  %p3277_p11 = scmp.lt.s32.totalorder %s4195_s7, %s3275_s29 }
 0x2be   : > { %p3278_p7 = scmp.lt.s32.totalorder %s3276_s2, %s3270_s26 }
 0x2c0   : > { %p3279_p3 = por %p3278_p7, %p3277_p11 }
 0x2c2   : > { %p3280_p9 = pnand %p3279_p3, %p3273_p0 }
 0x2c4   : > { %3283 = shalt.err (!%p3280_p9)
}
 0x2c5   : > { %s3284_s5 = scalar_lea.hbm %s4200_s0, 4096  ;;  %s3288_s11 = scalar_lea.hbm %s4360_s10, 16384 }
 0x2c6   : > { %p3285_p4 = scmp.ne.s32.totalorder %s4200_s0, %s3284_s5  ;;  %p3289_p12 = scmp.lt.u32.totalorder %s4200_s0, %s4360_s10 }
 0x2c7   : > { %p3290_p2 = scmp.lt.u32.totalorder %s3288_s11, %s3284_s5  ;;  %p3292_p13 = scmp.lt.u32.totalorder %s3284_s5, %s4200_s0 }
 0x2c8   : > { %p3286_p1 = pnand %p3285_p4, %p4361_p10 }
 0x2c9   : > { %p3291_p6 = por %p3290_p2, %p3289_p12 }
 0x2ca   : > { %p3287_p5 = pneg %p3286_p1 }
 0x2cb   : > { %p3293_p8 = por %p3292_p13, %p3291_p6 }
 0x2cd   : > { %p3294_p0 = pnand %p3293_p8, %p3287_p5 }
 0x2cf   : > { %3297 = shalt.err (!%p3294_p0)
}
 0x2d0   : > { %s3452_s12 = smov 128   ;;  %s3453_s8 = smov 256  }
 0x2d1   : > { %s3454_s21 = smov 8  }
 0x2d2   : > { %2833 = dma.vmem_to_hbm [thread:$0]  (%p4361_p10), %s4195_s7, 4096, %s4200_s0, %s4204_s4, %s3452_s12, %s3453_s8, %s3454_s21  }
 0x2d3 PF: > { %p2850_p11 = scmp.ge.s32.totalorder %s3440_s30, 2  ;;  %s2394_s26 = sand.u32 1, %s3380_s15  }
 0x2d4   : > { %p4362_p7 = scmp.ne.s32.totalorder %s4342_s13, 0  ;;  %s2395_s14 = scalar_lea.sflag [#allocation5], %s2394_s26 }
 0x2d6   : > { %p2846_p3 = pnand %p2850_p11, %p4362_p7 }
 0x2d8   : > { %3375 = dma.done.wait (!%p2846_p3), %s2395_s14, 4096  }
 0x2d9   : > { %3377 = vsyncadd (!%p2846_p3), %s2395_s14, 4294963200  ;;  %s23_s30 = sadd.s32 1, %s3440_s30   ;;  %s4364_s18 = sld [smem:[#allocation14_spill]] }
 0x2da   : > { %p4233_p9 = scmp.ge.s32.totalorder %s23_s30, 10   ;;  %s4365_s7 = sld [smem:[#allocation23_spill]] }
 0x2db   : > { %s4366_s26 = sld [smem:[#allocation18_spill]]  ;;  %s4367_s13 = sld [smem:[#allocation19_spill]] }
 0x2dc   : > { %s4368_s0 = sld [smem:[#allocation20_spill]]  ;;  %s4369_s4 = sld [smem:[#allocation22_spill]] }
 0x2dd   : > { %s4370_s15 = smov %s3384_s16  ;;  %s4372_s16 = smov %s3388_s17 }
 0x2de   : > { %s4373_s17 = smov %s3756_s1  ;;  %s4374_s19 = smov %s3400_s20 }
 0x2df   : > { %s4376_s21 = smov %s3408_s22  ;;  %s4377_s22 = smov %s3412_s23 }
 0x2e0   : > { %s4375_s20 = smov %s4365_s7  ;;  %s4378_s23 = smov %s3690_s25 }
 0x2e1   : > { %s4379_s24 = smov %s3428_s27  ;;  %s4380_s25 = smov %s3432_s28 }
 0x2e2   : > { %s4381_s27 = smov %s4367_s13  ;;  %s4382_s28 = smov %s4368_s0 }
 0x2e3   : > { %s4383_s29 = smov %s4369_s4  ;;  %22 = sbr.rel (!%p4233_p9) target bundleno = 18 (0x12), region = 116 }
 0x2ea   :  { %2400 = vsyncpa [#allocation4], 1 }
 0x2eb   :  { %2402 = vsyncpa [#allocation4 + $0x1], 1 }
 0x2ec   :  { %2403 = vsyncpa [#allocation7], 1 }
 0x2ed   :  { %2405 = vsyncpa [#allocation7 + $0x1], 1 }
 0x2ee   :  { %2406 = vsyncpa [#allocation5], 1 }
 0x2ef   :  { %2408 = vsyncpa [#allocation5 + $0x1], 1 }

</bundles_post_ra>
